<compile_context>
chip_gen: v7x
topology: tpu7x:2x2x1
jax: 0.10.0
libtpu: 0.0.40
codegen_flags: <defaults>
</compile_context>

<pallas_src>
import functools
from math import sqrt

import jax
import jax.numpy as jnp
from jax import lax
from jax.experimental import pallas as pl
from jax.experimental.pallas import tpu as pltpu


_LN_EPS = 1e-5
# EUP approximate reciprocal in the softmax denominator (~1e-3 rel. error vs.
# an exact divide).  Set False to match the reference divide more closely.
_APPROX_SOFTMAX_RECIP = True


# ------------------------------ small helpers --------------------------------

def _pick_tb(b, l):
    """Batch-tile size per grid step.

    Folds as many batch rows as possible into the matmul M dimension while
    (a) keeping >= 2 grid steps whenever b >= 2 so v7x's two TensorCores both
    get work, and (b) capping TB*l so per-step activations stay modest.
    """
    best = 1
    for tb in range(1, b + 1):
        if b % tb:
            continue
        if b >= 2 and b // tb < 2:
            continue
        if tb * l > 256:
            continue
        best = max(best, tb)
    return best


def _masked_layer_norm(x, gamma, beta, d_real):
    """LayerNorm over the first `d_real` columns of a lane-padded activation.

    Padded columns of `x` are zero by construction, so only the centered term
    needs an explicit mask before the variance reduction.
    """
    d_pad = x.shape[-1]
    inv_d = 1.0 / d_real
    mu = jnp.sum(x, axis=-1, keepdims=True) * inv_d
    diff = x - mu
    if d_real != d_pad:
        col = lax.broadcasted_iota(jnp.int32, x.shape, x.ndim - 1)
        diff = jnp.where(col < d_real, diff, 0.0)
    var = jnp.sum(diff * diff, axis=-1, keepdims=True) * inv_d
    return diff * lax.rsqrt(var + _LN_EPS) * gamma + beta


# ------------------------------- Block kernel --------------------------------

def block_kernel(x_ref, ln_ref, w_in_ref, w_out_ref, sq_ref, alibi_ref, o_ref,
                 *, heads, d_head, d_model):
    """One transformer block (plus residual add) for a TB-sequence batch tile."""
    tb, l, d_pad = x_ref.shape
    de = heads * d_head
    m = tb * l

    # Fold the batch tile into the matmul M dimension (layout-preserving
    # reshape: l == sublane tile, d_pad == lane tile).
    x = x_ref[...].reshape(m, d_pad)                            # (m, d_pad) f32

    # Sandwich LN (input side) + fused in-projection (bf16 MXU, f32 accum).
    xn = _masked_layer_norm(x, ln_ref[0], ln_ref[1], d_model)
    qkvp = jnp.dot(xn.astype(jnp.bfloat16), w_in_ref[...],
                   preferred_element_type=jnp.float32)          # (m, 4*de) f32

    q = qkvp[:, 0 * de:1 * de]
    k = qkvp[:, 1 * de:2 * de]
    v = qkvp[:, 2 * de:3 * de]
    p = qkvp[:, 3 * de:4 * de]

    # Smeared keys, all heads at once:
    #   k_i <- (1 - smear_h) * k_i + smear_h * k_{i-1},  k_{-1} = 0.
    # One XLU sublane roll; rows with (row % l) == 0 are the first token of
    # each folded sequence and get a zeroed predecessor.
    k_prev = pltpu.roll(k, shift=1, axis=0)
    row_id = lax.broadcasted_iota(jnp.int32, (m, de), 0)
    k_prev = jnp.where(row_id % l == 0, 0.0, k_prev)
    smear = sq_ref[0]                                           # (de,)
    k = (1.0 - smear) * k + smear * k_prev

    # Full attention scale 1/(s_h^2 * sqrt(d_head)) folded into q (one f32 mul).
    q = q * sq_ref[1]

    # bf16 copies for the MXU; the f32 full-width q/k/v die here.
    q_b = q.astype(jnp.bfloat16)
    k_b = k.astype(jnp.bfloat16)
    v_b = v.astype(jnp.bfloat16)

    # Head-batched relayout: (m, de) -> (g = tb*heads, l, d_head).
    # TODO(synk): replace the slice+stack (and the concatenate below) with a
    # single grouped-dim relayout (pltpu.einshape) once verified to lower for
    # this layout; stack/concat kept here for lowering robustness.
    def to_heads(t):
        return jnp.stack(
            [t[s * l:(s + 1) * l, h * d_head:(h + 1) * d_head]
             for s in range(tb) for h in range(heads)], axis=0)

    q3 = to_heads(q_b)                                          # (g, l, dh) bf16
    k3 = to_heads(k_b)
    v3 = to_heads(v_b)

    scores = jnp.einsum('gqd,gkd->gqk', q3, k3,
                        preferred_element_type=jnp.float32)     # (g, l, l) f32

    # ALiBi bias (tiny (g, 1, l) precomputed row) + in-kernel causal mask.
    col = lax.broadcasted_iota(jnp.int32, (l, l), 1)
    row = lax.broadcasted_iota(jnp.int32, (l, l), 0)
    causal = jnp.where(col > row, jnp.float32(-1e10), jnp.float32(0.0))
    scores = scores + alibi_ref[...] + causal[None, :, :]

    # Softmax in f32; divide via the EUP reciprocal.
    mx = jnp.max(scores, axis=-1, keepdims=True)
    e = jnp.exp(scores - mx)
    denom = jnp.sum(e, axis=-1, keepdims=True)
    probs = e * pl.reciprocal(denom, approx=_APPROX_SOFTMAX_RECIP)

    o3 = jnp.einsum('gqk,gkd->gqd', probs.astype(jnp.bfloat16), v3,
                    preferred_element_type=jnp.float32)         # (g, l, dh) f32

    # Back to (m, de): lanes-concat over heads per sequence, rows over tb.
    o2 = jnp.concatenate(
        [jnp.concatenate([o3[s * heads + h] for h in range(heads)], axis=-1)
         for s in range(tb)], axis=0)                           # (m, de) f32

    # SwiGLU-style gating with the parallel branch, out-projection, out-LN.
    gated = jax.nn.silu(p) * o2
    y = jnp.dot(gated.astype(jnp.bfloat16), w_out_ref[...],
                preferred_element_type=jnp.float32)             # (m, d_pad)
    yn = _masked_layer_norm(y, ln_ref[2], ln_ref[3], d_model)

    o_ref[...] = (x + yn).reshape(tb, l, d_pad)                 # fused residual


def block_forward(x, bp, alibi_tiled, *, heads, d_head, d_model, tb):
    b, l, d_pad = x.shape
    de = heads * d_head
    g = tb * heads
    kernel = functools.partial(block_kernel, heads=heads, d_head=d_head,
                               d_model=d_model)
    return pl.pallas_call(
        kernel,
        out_shape=jax.ShapeDtypeStruct((b, l, d_pad), jnp.float32),
        grid=(b // tb,),
        in_specs=[
            pl.BlockSpec((tb, l, d_pad), lambda i: (i, 0, 0)),   # x (batch tile)
            pl.BlockSpec((4, d_pad), lambda i: (0, 0)),          # packed LN g/b
            pl.BlockSpec((d_pad, 4 * de), lambda i: (0, 0)),     # w_in  (bf16)
            pl.BlockSpec((de, d_pad), lambda i: (0, 0)),         # w_out (bf16)
            pl.BlockSpec((2, de), lambda i: (0, 0)),             # smear | qscale
            pl.BlockSpec((g, 1, l), lambda i: (0, 0, 0)),        # ALiBi rows
        ],
        out_specs=pl.BlockSpec((tb, l, d_pad), lambda i: (i, 0, 0)),
        input_output_aliases={0: 0},                             # reuse x buffer
        compiler_params=pltpu.CompilerParams(
            dimension_semantics=("parallel",),
            vmem_limit_bytes=32 * 1024 * 1024),
    )(x, bp["ln"], bp["w_in"], bp["w_out"], bp["smear_qscale"], alibi_tiled)


# ------------------------------ Unembed kernel --------------------------------

def unembed_kernel(x_ref, ln_ref, wu_ref, bu_ref, o_ref, xn_ref, *, d_model):
    tb, l, d_pad = x_ref.shape
    tv = o_ref.shape[-1]
    m = tb * l

    # LayerNorm + bf16 cast hoisted out of the vocab-tile axis: computed once
    # per batch tile (vocab step 0) into VMEM scratch and reused for every j.
    @pl.when(pl.program_id(1) == 0)
    def _():
        x = x_ref[...].reshape(m, d_pad)
        xn = _masked_layer_norm(x, ln_ref[0], ln_ref[1], d_model)
        xn_ref[...] = xn.astype(jnp.bfloat16)

    logits = jnp.dot(xn_ref[...], wu_ref[...],
                     preferred_element_type=jnp.float32) + bu_ref[0]
    o_ref[...] = logits.reshape(tb, l, tv)


def unembed_forward(x, up, *, d_model, tb):
    b, l, d_pad = x.shape
    vp = up["w_u"].shape[1]                  # vocab padded to a 256-multiple
    # Widest lane-dense vocab tile (256-multiple; also a 128-multiple for v5e)
    # that keeps the double-buffered bf16 weight tile under a modest budget
    # (conservative enough for v7x's 64 MiB VMEM).
    tv = vp
    max_tv = 2048
    if tv > max_tv:
        tv = max_tv
        while vp % tv:
            tv -= 256
    return pl.pallas_call(
        functools.partial(unembed_kernel, d_model=d_model),
        out_shape=jax.ShapeDtypeStruct((b, l, vp), jnp.float32),
        grid=(b // tb, vp // tv),
        in_specs=[
            pl.BlockSpec((tb, l, d_pad), lambda i, j: (i, 0, 0)),
            pl.BlockSpec((2, d_pad), lambda i, j: (0, 0)),       # packed LN g/b
            pl.BlockSpec((d_pad, tv), lambda i, j: (0, j)),      # vocab-tiled W_u
            pl.BlockSpec((1, tv), lambda i, j: (0, j)),          # vocab-tiled b_u
        ],
        out_specs=pl.BlockSpec((tb, l, tv), lambda i, j: (i, 0, j)),
        scratch_shapes=[pltpu.VMEM((tb * l, d_pad), jnp.bfloat16)],
        compiler_params=pltpu.CompilerParams(
            dimension_semantics=("parallel", "arbitrary"),
            vmem_limit_bytes=32 * 1024 * 1024),
    )(x, up["ln"], up["w_u"], up["b_u"])


# ------------------------------ Model wrapper ---------------------------------

def init_params(key, *, depth, heads, d_model, vocab_size, expansion_factor):
    de = d_model * expansion_factor
    d_head = de // heads
    d_pad = ((d_model + 127) // 128) * 128   # lane-dense residual width
    vp = ((vocab_size + 255) // 256) * 256   # vocab padded to a 256-multiple

    def pad_cols(w, width):
        return jnp.pad(w, ((0, 0), (0, width - w.shape[1])))

    def pad_rows(w, height):
        return jnp.pad(w, ((0, height - w.shape[0]), (0, 0)))

    params = {"blocks": []}
    key, ek = jax.random.split(key)
    embed = 0.02 * jax.random.normal(ek, (vocab_size + 1, d_model), jnp.float32)
    params["embed"] = pad_cols(embed, d_pad)

    gamma_pad = jnp.pad(jnp.ones((d_model,), jnp.float32), (0, d_pad - d_model))
    beta_pad = jnp.zeros((d_pad,), jnp.float32)

    for _ in range(depth):
        key, k1, k2 = jax.random.split(key, 3)
        smear_factor = jnp.linspace(-6.0, 6.0, heads, dtype=jnp.float32)
        log_scale = jnp.zeros((heads,), jnp.float32)
        s = jnp.exp(log_scale)
        w_in = 0.02 * jax.random.normal(k1, (d_model, 4 * de), jnp.float32)
        w_out = (0.02 / sqrt(2 * depth)) * jax.random.normal(
            k2, (de, d_model), jnp.float32)
        params["blocks"].append({
            # packed LN params, rows = [in_gamma, in_beta, out_gamma, out_beta]
            "ln": jnp.stack([gamma_pad, beta_pad, gamma_pad, beta_pad], axis=0),
            # weights pre-transposed to (in, out), zero-padded in d_model, bf16:
            "w_in": pad_rows(w_in, d_pad).astype(jnp.bfloat16),
            "w_out": pad_cols(w_out, d_pad).astype(jnp.bfloat16),
            # packed per-head scalars broadcast over each head's d_head lanes:
            #   row 0: sigmoid(smear_factor);  row 1: 1 / (s^2 * sqrt(d_head))
            "smear_qscale": jnp.stack([
                jnp.repeat(jax.nn.sigmoid(smear_factor), d_head),
                jnp.repeat(1.0 / (s * s * sqrt(d_head)), d_head)], axis=0),
        })

    key, ku = jax.random.split(key)
    w_u = 0.02 * jax.random.normal(ku, (d_model, vocab_size), jnp.float32)
    params["unembed"] = {
        "ln": jnp.stack([gamma_pad, beta_pad], axis=0),
        "w_u": pad_cols(pad_rows(w_u, d_pad), vp).astype(jnp.bfloat16),
        "b_u": jnp.zeros((1, vp), jnp.float32),
    }
    return params


def make_alibi(heads, l):
    # slopes = cat(logspace_base2(0, -8, heads//2), zeros(heads - heads//2))
    slopes = jnp.concatenate([
        2.0 ** jnp.linspace(0.0, -8.0, heads // 2),
        jnp.zeros((heads - heads // 2,), jnp.float32),
    ]).astype(jnp.float32)
    # Only the tiny (heads, 1, l) ALiBi row is materialized; the causal part of
    # the reference mask is regenerated inside the kernel with iota/where.
    return slopes[:, None, None] * jnp.arange(l, dtype=jnp.float32)[None, None, :]


@functools.partial(jax.jit,
                   static_argnames=("heads", "d_head", "d_model", "vocab_size"))
def transformer_forward(tokens, params, *, heads, d_head, d_model, vocab_size):
    b, l = tokens.shape
    x = jnp.take(params["embed"], tokens, axis=0)       # embedding gather (glue)
    tb = _pick_tb(b, l)
    alibi_tiled = jnp.tile(make_alibi(heads, l), (tb, 1, 1))   # (tb*heads, 1, l)
    for bp in params["blocks"]:
        x = block_forward(x, bp, alibi_tiled, heads=heads, d_head=d_head,
                          d_model=d_model, tb=tb)       # includes residual add
    logits = unembed_forward(x, params["unembed"], d_model=d_model, tb=tb)
    return logits[:, :, :vocab_size]                    # drop vocab padding


# ----------------------------------- main --------------------------------------

if __name__ == "__main__":
    depth = 2
    heads = 4
    d_model = 32
    vocab_size = 50
    expansion_factor = 2

    batch, seq = 4, 8            # batch=4 -> two "parallel" grid steps of TB=2
    de = d_model * expansion_factor
    d_head = de // heads

    key = jax.random.PRNGKey(0)
    pkey, tkey = jax.random.split(key)
    params = init_params(pkey, depth=depth, heads=heads, d_model=d_model,
                         vocab_size=vocab_size,
                         expansion_factor=expansion_factor)
    tokens = jax.random.randint(tkey, (batch, seq), 0, vocab_size + 1,
                                dtype=jnp.int32)

    logits = transformer_forward(tokens, params, heads=heads, d_head=d_head,
                                 d_model=d_model, vocab_size=vocab_size)
    logits = jax.block_until_ready(logits)
    assert logits.shape == (batch, seq, vocab_size)
    assert bool(jnp.all(jnp.isfinite(logits)))
    print("KERNEL_OK")
</pallas_src>

<mosaic_0001>
module attributes {stable_mosaic.version = 11 : i64} {
  func.func @unembed_kernel(%arg0: i32, %arg1: i32, %arg2: memref<2x8x128xf32, #tpu.memory_space<vmem>>, %arg3: memref<2x128xf32, #tpu.memory_space<vmem>>, %arg4: memref<128x256xbf16, #tpu.memory_space<vmem>>, %arg5: memref<1x256xf32, #tpu.memory_space<vmem>>, %arg6: memref<2x8x256xf32, #tpu.memory_space<vmem>>, %arg7: memref<16x128xbf16, #tpu.memory_space<vmem>>) attributes {dimension_semantics = [#tpu.dimension_semantics<parallel>, #tpu.dimension_semantics<arbitrary>], iteration_bounds = array<i64: 2, 1>, scalar_prefetch = 0 : i64, scratch_operands = 1 : i64, tpu.core_type = #tpu.core_type<tc>, window_params = [{transform_indices = @transform_0, window_bounds = array<i64: 2, 8, 128>}, {pipeline_mode = #tpu.pipeline_mode<synchronous>, transform_indices = @transform_1, window_bounds = array<i64: 2, 128>}, {transform_indices = @transform_2, window_bounds = array<i64: 128, 256>}, {transform_indices = @transform_3, window_bounds = array<i64: 1, 256>}, {transform_indices = @transform_4, window_bounds = array<i64: 2, 8, 256>}]} {
    %c0_i32 = arith.constant 0 : i32
    %0 = arith.cmpi eq, %arg1, %c0_i32 : i32
    %1 = arith.extui %0 : i1 to i32
    %c0_i32_0 = arith.constant 0 : i32
    %2 = arith.cmpi ne, %1, %c0_i32_0 : i32
    scf.if %2 {
      %c0_9 = arith.constant 0 : index
      %c0_10 = arith.constant 0 : index
      %c0_11 = arith.constant 0 : index
      %13 = vector.load %arg2[%c0_9, %c0_10, %c0_11] : memref<2x8x128xf32, #tpu.memory_space<vmem>>, vector<2x8x128xf32>
      %14 = vector.shape_cast %13 : vector<2x8x128xf32> to vector<16x128xf32>
      %c0_12 = arith.constant 0 : index
      %c0_13 = arith.constant 0 : index
      %15 = vector.load %arg3[%c0_12, %c0_13] : memref<2x128xf32, #tpu.memory_space<vmem>>, vector<1x128xf32>
      %16 = vector.shape_cast %15 : vector<1x128xf32> to vector<128xf32>
      %c1 = arith.constant 1 : index
      %c0_14 = arith.constant 0 : index
      %17 = vector.load %arg3[%c1, %c0_14] : memref<2x128xf32, #tpu.memory_space<vmem>>, vector<1x128xf32>
      %18 = vector.shape_cast %17 : vector<1x128xf32> to vector<128xf32>
      %cst_15 = arith.constant dense<0.000000e+00> : vector<16xf32>
      %19 = vector.multi_reduction <add>, %14, %cst_15 [1] : vector<16x128xf32> to vector<16xf32>
      %20 = vector.shape_cast %19 : vector<16xf32> to vector<16x1xf32>
      %cst_16 = arith.constant 3.125000e-02 : f32
      %21 = vector.broadcast %cst_16 : f32 to vector<16x1xf32>
      %22 = arith.mulf %20, %21 : vector<16x1xf32>
      %23 = vector.broadcast %22 : vector<16x1xf32> to vector<16x128xf32>
      %24 = arith.subf %14, %23 : vector<16x128xf32>
      %25 = tpu.iota {dimensions = array<i32: 1>} : vector<16x128xi32>
      %c32_i32 = arith.constant 32 : i32
      %26 = vector.broadcast %c32_i32 : i32 to vector<16x128xi32>
      %27 = arith.cmpi slt, %25, %26 : vector<16x128xi32>
      %cst_17 = arith.constant 0.000000e+00 : f32
      %28 = vector.broadcast %cst_17 : f32 to vector<16x128xf32>
      %29 = arith.select %27, %24, %28 : vector<16x128xi1>, vector<16x128xf32>
      %30 = arith.mulf %29, %29 : vector<16x128xf32>
      %cst_18 = arith.constant dense<0.000000e+00> : vector<16xf32>
      %31 = vector.multi_reduction <add>, %30, %cst_18 [1] : vector<16x128xf32> to vector<16xf32>
      %32 = vector.shape_cast %31 : vector<16xf32> to vector<16x1xf32>
      %cst_19 = arith.constant 3.125000e-02 : f32
      %33 = vector.broadcast %cst_19 : f32 to vector<16x1xf32>
      %34 = arith.mulf %32, %33 : vector<16x1xf32>
      %cst_20 = arith.constant 9.99999974E-6 : f32
      %35 = vector.broadcast %cst_20 : f32 to vector<16x1xf32>
      %36 = arith.addf %34, %35 : vector<16x1xf32>
      %37 = math.rsqrt %36 : vector<16x1xf32>
      %38 = vector.broadcast %37 : vector<16x1xf32> to vector<16x128xf32>
      %39 = arith.mulf %29, %38 : vector<16x128xf32>
      %40 = vector.shape_cast %16 : vector<128xf32> to vector<1x128xf32>
      %41 = vector.broadcast %40 : vector<1x128xf32> to vector<16x128xf32>
      %42 = arith.mulf %39, %41 : vector<16x128xf32>
      %43 = vector.shape_cast %18 : vector<128xf32> to vector<1x128xf32>
      %44 = vector.broadcast %43 : vector<1x128xf32> to vector<16x128xf32>
      %45 = arith.addf %42, %44 : vector<16x128xf32>
      %46 = arith.truncf %45 : vector<16x128xf32> to vector<16x128xbf16>
      %c0_21 = arith.constant 0 : index
      %c0_22 = arith.constant 0 : index
      %47 = vector.load %arg7[%c0_21, %c0_22] : memref<16x128xbf16, #tpu.memory_space<vmem>>, vector<16x128xbf16>
      tpu.vector_store %arg7[%c0_21, %c0_22], %46 {strides = array<i32>} : memref<16x128xbf16, #tpu.memory_space<vmem>>, vector<16x128xbf16>,
    } else {
    }
    %c0 = arith.constant 0 : index
    %c0_1 = arith.constant 0 : index
    %3 = vector.load %arg7[%c0, %c0_1] : memref<16x128xbf16, #tpu.memory_space<vmem>>, vector<16x128xbf16>
    %c0_2 = arith.constant 0 : index
    %c0_3 = arith.constant 0 : index
    %4 = vector.load %arg4[%c0_2, %c0_3] : memref<128x256xbf16, #tpu.memory_space<vmem>>, vector<128x256xbf16>
    %cst = arith.constant dense<0.000000e+00> : vector<16x256xf32>
    %5 = tpu.matmul %3, %4, %cst {dimension_numbers = #tpu.dot_dimension_numbers<[1], [0], [0], [1], [0, 0, 1, 1], [], []>} : vector<16x128xbf16>, vector<128x256xbf16>, vector<16x256xf32> -> vector<16x256xf32>
    %c0_4 = arith.constant 0 : index
    %c0_5 = arith.constant 0 : index
    %6 = vector.load %arg5[%c0_4, %c0_5] : memref<1x256xf32, #tpu.memory_space<vmem>>, vector<1x256xf32>
    %7 = vector.shape_cast %6 : vector<1x256xf32> to vector<256xf32>
    %8 = vector.shape_cast %7 : vector<256xf32> to vector<1x256xf32>
    %9 = vector.broadcast %8 : vector<1x256xf32> to vector<16x256xf32>
    %10 = arith.addf %5, %9 : vector<16x256xf32>
    %11 = vector.shape_cast %10 : vector<16x256xf32> to vector<2x8x256xf32>
    %c0_6 = arith.constant 0 : index
    %c0_7 = arith.constant 0 : index
    %c0_8 = arith.constant 0 : index
    %12 = vector.load %arg6[%c0_6, %c0_7, %c0_8] : memref<2x8x256xf32, #tpu.memory_space<vmem>>, vector<2x8x256xf32>
    tpu.vector_store %arg6[%c0_6, %c0_7, %c0_8], %11 {strides = array<i32>} : memref<2x8x256xf32, #tpu.memory_space<vmem>>, vector<2x8x256xf32>,
    return
  }
  func.func @transform_0(%arg0: i32, %arg1: i32) -> (i32, i32, i32) {
    %c0_i32 = arith.constant 0 : i32
    %c0_i32_0 = arith.constant 0 : i32
    %c0_i32_1 = arith.constant 0 : i32
    return %arg0, %c0_i32, %c0_i32_0 : i32, i32, i32
  }
  func.func @transform_1(%arg0: i32, %arg1: i32) -> (i32, i32) {
    %c0_i32 = arith.constant 0 : i32
    %c0_i32_0 = arith.constant 0 : i32
    %c0_i32_1 = arith.constant 0 : i32
    return %c0_i32, %c0_i32_0 : i32, i32
  }
  func.func @transform_2(%arg0: i32, %arg1: i32) -> (i32, i32) {
    %c0_i32 = arith.constant 0 : i32
    %c0_i32_0 = arith.constant 0 : i32
    return %c0_i32, %arg1 : i32, i32
  }
  func.func @transform_3(%arg0: i32, %arg1: i32) -> (i32, i32) {
    %c0_i32 = arith.constant 0 : i32
    %c0_i32_0 = arith.constant 0 : i32
    return %c0_i32, %arg1 : i32, i32
  }
  func.func @transform_4(%arg0: i32, %arg1: i32) -> (i32, i32, i32) {
    %c0_i32 = arith.constant 0 : i32
    %c0_i32_0 = arith.constant 0 : i32
    return %arg0, %c0_i32, %arg1 : i32, i32, i32
  }
}

module attributes {stable_mosaic.version = 11 : i64} {
  func.func @block_kernel(%arg0: i32, %arg1: memref<2x8x128xf32, #tpu.memory_space<vmem>>, %arg2: memref<4x128xf32, #tpu.memory_space<vmem>>, %arg3: memref<128x256xbf16, #tpu.memory_space<vmem>>, %arg4: memref<64x128xbf16, #tpu.memory_space<vmem>>, %arg5: memref<2x64xf32, #tpu.memory_space<vmem>>, %arg6: memref<8x1x8xf32, #tpu.memory_space<vmem>>, %arg7: memref<2x8x128xf32, #tpu.memory_space<vmem>>) attributes {dimension_semantics = [#tpu.dimension_semantics<parallel>], iteration_bounds = array<i64: 2>, scalar_prefetch = 0 : i64, scratch_operands = 0 : i64, tpu.core_type = #tpu.core_type<tc>, window_params = [{transform_indices = @transform_0, window_bounds = array<i64: 2, 8, 128>}, {pipeline_mode = #tpu.pipeline_mode<synchronous>, transform_indices = @transform_1, window_bounds = array<i64: 4, 128>}, {pipeline_mode = #tpu.pipeline_mode<synchronous>, transform_indices = @transform_2, window_bounds = array<i64: 128, 256>}, {pipeline_mode = #tpu.pipeline_mode<synchronous>, transform_indices = @transform_3, window_bounds = array<i64: 64, 128>}, {pipeline_mode = #tpu.pipeline_mode<synchronous>, transform_indices = @transform_4, window_bounds = array<i64: 2, 64>}, {pipeline_mode = #tpu.pipeline_mode<synchronous>, transform_indices = @transform_5, window_bounds = array<i64: 8, 1, 8>}, {transform_indices = @transform_6, window_bounds = array<i64: 2, 8, 128>}]} {
    %c0 = arith.constant 0 : index
    %c0_0 = arith.constant 0 : index
    %c0_1 = arith.constant 0 : index
    %0 = vector.load %arg1[%c0, %c0_0, %c0_1] : memref<2x8x128xf32, #tpu.memory_space<vmem>>, vector<2x8x128xf32>
    %1 = vector.shape_cast %0 : vector<2x8x128xf32> to vector<16x128xf32>
    %c0_2 = arith.constant 0 : index
    %c0_3 = arith.constant 0 : index
    %2 = vector.load %arg2[%c0_2, %c0_3] : memref<4x128xf32, #tpu.memory_space<vmem>>, vector<1x128xf32>
    %3 = vector.shape_cast %2 : vector<1x128xf32> to vector<128xf32>
    %c1 = arith.constant 1 : index
    %c0_4 = arith.constant 0 : index
    %4 = vector.load %arg2[%c1, %c0_4] : memref<4x128xf32, #tpu.memory_space<vmem>>, vector<1x128xf32>
    %5 = vector.shape_cast %4 : vector<1x128xf32> to vector<128xf32>
    %cst = arith.constant dense<0.000000e+00> : vector<16xf32>
    %6 = vector.multi_reduction <add>, %1, %cst [1] : vector<16x128xf32> to vector<16xf32>
    %7 = vector.shape_cast %6 : vector<16xf32> to vector<16x1xf32>
    %cst_5 = arith.constant 3.125000e-02 : f32
    %8 = vector.broadcast %cst_5 : f32 to vector<16x1xf32>
    %9 = arith.mulf %7, %8 : vector<16x1xf32>
    %10 = vector.broadcast %9 : vector<16x1xf32> to vector<16x128xf32>
    %11 = arith.subf %1, %10 : vector<16x128xf32>
    %12 = tpu.iota {dimensions = array<i32: 1>} : vector<16x128xi32>
    %c32_i32 = arith.constant 32 : i32
    %13 = vector.broadcast %c32_i32 : i32 to vector<16x128xi32>
    %14 = arith.cmpi slt, %12, %13 : vector<16x128xi32>
    %cst_6 = arith.constant 0.000000e+00 : f32
    %15 = vector.broadcast %cst_6 : f32 to vector<16x128xf32>
    %16 = arith.select %14, %11, %15 : vector<16x128xi1>, vector<16x128xf32>
    %17 = arith.mulf %16, %16 : vector<16x128xf32>
    %cst_7 = arith.constant dense<0.000000e+00> : vector<16xf32>
    %18 = vector.multi_reduction <add>, %17, %cst_7 [1] : vector<16x128xf32> to vector<16xf32>
    %19 = vector.shape_cast %18 : vector<16xf32> to vector<16x1xf32>
    %cst_8 = arith.constant 3.125000e-02 : f32
    %20 = vector.broadcast %cst_8 : f32 to vector<16x1xf32>
    %21 = arith.mulf %19, %20 : vector<16x1xf32>
    %cst_9 = arith.constant 9.99999974E-6 : f32
    %22 = vector.broadcast %cst_9 : f32 to vector<16x1xf32>
    %23 = arith.addf %21, %22 : vector<16x1xf32>
    %24 = math.rsqrt %23 : vector<16x1xf32>
    %25 = vector.broadcast %24 : vector<16x1xf32> to vector<16x128xf32>
    %26 = arith.mulf %16, %25 : vector<16x128xf32>
    %27 = vector.shape_cast %3 : vector<128xf32> to vector<1x128xf32>
    %28 = vector.broadcast %27 : vector<1x128xf32> to vector<16x128xf32>
    %29 = arith.mulf %26, %28 : vector<16x128xf32>
    %30 = vector.shape_cast %5 : vector<128xf32> to vector<1x128xf32>
    %31 = vector.broadcast %30 : vector<1x128xf32> to vector<16x128xf32>
    %32 = arith.addf %29, %31 : vector<16x128xf32>
    %33 = arith.truncf %32 : vector<16x128xf32> to vector<16x128xbf16>
    %c0_10 = arith.constant 0 : index
    %c0_11 = arith.constant 0 : index
    %34 = vector.load %arg3[%c0_10, %c0_11] : memref<128x256xbf16, #tpu.memory_space<vmem>>, vector<128x256xbf16>
    %cst_12 = arith.constant dense<0.000000e+00> : vector<16x256xf32>
    %35 = tpu.matmul %33, %34, %cst_12 {dimension_numbers = #tpu.dot_dimension_numbers<[1], [0], [0], [1], [0, 0, 1, 1], [], []>} : vector<16x128xbf16>, vector<128x256xbf16>, vector<16x256xf32> -> vector<16x256xf32>
    %36 = vector.extract_strided_slice %35 {offsets = [0, 0], sizes = [16, 64], strides = [1, 1]} : vector<16x256xf32> to vector<16x64xf32>
    %37 = vector.extract_strided_slice %35 {offsets = [0, 64], sizes = [16, 64], strides = [1, 1]} : vector<16x256xf32> to vector<16x64xf32>
    %38 = vector.extract_strided_slice %35 {offsets = [0, 128], sizes = [16, 64], strides = [1, 1]} : vector<16x256xf32> to vector<16x64xf32>
    %39 = vector.extract_strided_slice %35 {offsets = [0, 192], sizes = [16, 64], strides = [1, 1]} : vector<16x256xf32> to vector<16x64xf32>
    %c1_i32 = arith.constant 1 : i32
    %40 = tpu.dynamic_rotate %37 by %c1_i32 dim 0 : vector<16x64xf32>, i32 -> vector<16x64xf32>
    %41 = tpu.iota {dimensions = array<i32: 0>} : vector<16x64xi32>
    %c8_i32 = arith.constant 8 : i32
    %c0_i32 = arith.constant 0 : i32
    %42 = arith.cmpi eq, %c8_i32, %c0_i32 : i32
    %c1_i32_13 = arith.constant 1 : i32
    %43 = arith.select %42, %c1_i32_13, %c8_i32 : i32
    %44 = vector.broadcast %43 : i32 to vector<16x64xi32>
    %45 = arith.remsi %41, %44 : vector<16x64xi32>
    %c0_i32_14 = arith.constant 0 : i32
    %46 = vector.broadcast %c0_i32_14 : i32 to vector<16x64xi32>
    %47 = arith.cmpi ne, %45, %46 : vector<16x64xi32>
    %c0_i32_15 = arith.constant 0 : i32
    %48 = vector.broadcast %c0_i32_15 : i32 to vector<16x64xi32>
    %49 = arith.cmpi slt, %45, %48 : vector<16x64xi32>
    %c0_i32_16 = arith.constant 0 : i32
    %50 = arith.cmpi slt, %43, %c0_i32_16 : i32
    %51 = vector.broadcast %50 : i1 to vector<16x64xi1>
    %52 = vector.broadcast %51 : vector<16x64xi1> to vector<16x64xi1>
    %53 = arith.xori %49, %52 : vector<16x64xi1>
    %54 = arith.andi %53, %47 : vector<16x64xi1>
    %55 = vector.broadcast %43 : i32 to vector<16x64xi32>
    %56 = arith.addi %45, %55 : vector<16x64xi32>
    %57 = arith.select %54, %56, %45 : vector<16x64xi1>, vector<16x64xi32>
    %c0_i32_17 = arith.constant 0 : i32
    %58 = vector.broadcast %c0_i32_17 : i32 to vector<16x64xi32>
    %59 = arith.cmpi eq, %57, %58 : vector<16x64xi32>
    %cst_18 = arith.constant 0.000000e+00 : f32
    %60 = vector.broadcast %cst_18 : f32 to vector<16x64xf32>
    %61 = arith.select %59, %60, %40 : vector<16x64xi1>, vector<16x64xf32>
    %c0_19 = arith.constant 0 : index
    %c0_20 = arith.constant 0 : index
    %62 = vector.load %arg5[%c0_19, %c0_20] : memref<2x64xf32, #tpu.memory_space<vmem>>, vector<1x64xf32>
    %63 = vector.shape_cast %62 : vector<1x64xf32> to vector<64xf32>
    %cst_21 = arith.constant 1.000000e+00 : f32
    %64 = vector.broadcast %cst_21 : f32 to vector<64xf32>
    %65 = arith.subf %64, %63 : vector<64xf32>
    %66 = vector.shape_cast %65 : vector<64xf32> to vector<1x64xf32>
    %67 = vector.broadcast %66 : vector<1x64xf32> to vector<16x64xf32>
    %68 = arith.mulf %67, %37 : vector<16x64xf32>
    %69 = vector.shape_cast %63 : vector<64xf32> to vector<1x64xf32>
    %70 = vector.broadcast %69 : vector<1x64xf32> to vector<16x64xf32>
    %71 = arith.mulf %70, %61 : vector<16x64xf32>
    %72 = arith.addf %68, %71 : vector<16x64xf32>
    %c1_22 = arith.constant 1 : index
    %c0_23 = arith.constant 0 : index
    %73 = vector.load %arg5[%c1_22, %c0_23] : memref<2x64xf32, #tpu.memory_space<vmem>>, vector<1x64xf32>
    %74 = vector.shape_cast %73 : vector<1x64xf32> to vector<64xf32>
    %75 = vector.shape_cast %74 : vector<64xf32> to vector<1x64xf32>
    %76 = vector.broadcast %75 : vector<1x64xf32> to vector<16x64xf32>
    %77 = arith.mulf %36, %76 : vector<16x64xf32>
    %78 = arith.truncf %77 : vector<16x64xf32> to vector<16x64xbf16>
    %79 = arith.truncf %72 : vector<16x64xf32> to vector<16x64xbf16>
    %80 = arith.truncf %38 : vector<16x64xf32> to vector<16x64xbf16>
    %81 = vector.extract_strided_slice %78 {offsets = [0, 0], sizes = [8, 16], strides = [1, 1]} : vector<16x64xbf16> to vector<8x16xbf16>
    %82 = vector.extract_strided_slice %78 {offsets = [0, 16], sizes = [8, 16], strides = [1, 1]} : vector<16x64xbf16> to vector<8x16xbf16>
    %83 = vector.extract_strided_slice %78 {offsets = [0, 32], sizes = [8, 16], strides = [1, 1]} : vector<16x64xbf16> to vector<8x16xbf16>
    %84 = vector.extract_strided_slice %78 {offsets = [0, 48], sizes = [8, 16], strides = [1, 1]} : vector<16x64xbf16> to vector<8x16xbf16>
    %85 = vector.extract_strided_slice %78 {offsets = [8, 0], sizes = [8, 16], strides = [1, 1]} : vector<16x64xbf16> to vector<8x16xbf16>
    %86 = vector.extract_strided_slice %78 {offsets = [8, 16], sizes = [8, 16], strides = [1, 1]} : vector<16x64xbf16> to vector<8x16xbf16>
    %87 = vector.extract_strided_slice %78 {offsets = [8, 32], sizes = [8, 16], strides = [1, 1]} : vector<16x64xbf16> to vector<8x16xbf16>
    %88 = vector.extract_strided_slice %78 {offsets = [8, 48], sizes = [8, 16], strides = [1, 1]} : vector<16x64xbf16> to vector<8x16xbf16>
    %89 = vector.shape_cast %81 : vector<8x16xbf16> to vector<1x8x16xbf16>
    %90 = vector.shape_cast %82 : vector<8x16xbf16> to vector<1x8x16xbf16>
    %91 = vector.shape_cast %83 : vector<8x16xbf16> to vector<1x8x16xbf16>
    %92 = vector.shape_cast %84 : vector<8x16xbf16> to vector<1x8x16xbf16>
    %93 = vector.shape_cast %85 : vector<8x16xbf16> to vector<1x8x16xbf16>
    %94 = vector.shape_cast %86 : vector<8x16xbf16> to vector<1x8x16xbf16>
    %95 = vector.shape_cast %87 : vector<8x16xbf16> to vector<1x8x16xbf16>
    %96 = vector.shape_cast %88 : vector<8x16xbf16> to vector<1x8x16xbf16>
    %97 = tpu.concatenate %89, %90, %91, %92, %93, %94, %95, %96 in 0 : vector<1x8x16xbf16>, vector<1x8x16xbf16>, vector<1x8x16xbf16>, vector<1x8x16xbf16>, vector<1x8x16xbf16>, vector<1x8x16xbf16>, vector<1x8x16xbf16>, vector<1x8x16xbf16> -> vector<8x8x16xbf16>
    %98 = vector.extract_strided_slice %79 {offsets = [0, 0], sizes = [8, 16], strides = [1, 1]} : vector<16x64xbf16> to vector<8x16xbf16>
    %99 = vector.extract_strided_slice %79 {offsets = [0, 16], sizes = [8, 16], strides = [1, 1]} : vector<16x64xbf16> to vector<8x16xbf16>
    %100 = vector.extract_strided_slice %79 {offsets = [0, 32], sizes = [8, 16], strides = [1, 1]} : vector<16x64xbf16> to vector<8x16xbf16>
    %101 = vector.extract_strided_slice %79 {offsets = [0, 48], sizes = [8, 16], strides = [1, 1]} : vector<16x64xbf16> to vector<8x16xbf16>
    %102 = vector.extract_strided_slice %79 {offsets = [8, 0], sizes = [8, 16], strides = [1, 1]} : vector<16x64xbf16> to vector<8x16xbf16>
    %103 = vector.extract_strided_slice %79 {offsets = [8, 16], sizes = [8, 16], strides = [1, 1]} : vector<16x64xbf16> to vector<8x16xbf16>
    %104 = vector.extract_strided_slice %79 {offsets = [8, 32], sizes = [8, 16], strides = [1, 1]} : vector<16x64xbf16> to vector<8x16xbf16>
    %105 = vector.extract_strided_slice %79 {offsets = [8, 48], sizes = [8, 16], strides = [1, 1]} : vector<16x64xbf16> to vector<8x16xbf16>
    %106 = vector.shape_cast %98 : vector<8x16xbf16> to vector<1x8x16xbf16>
    %107 = vector.shape_cast %99 : vector<8x16xbf16> to vector<1x8x16xbf16>
    %108 = vector.shape_cast %100 : vector<8x16xbf16> to vector<1x8x16xbf16>
    %109 = vector.shape_cast %101 : vector<8x16xbf16> to vector<1x8x16xbf16>
    %110 = vector.shape_cast %102 : vector<8x16xbf16> to vector<1x8x16xbf16>
    %111 = vector.shape_cast %103 : vector<8x16xbf16> to vector<1x8x16xbf16>
    %112 = vector.shape_cast %104 : vector<8x16xbf16> to vector<1x8x16xbf16>
    %113 = vector.shape_cast %105 : vector<8x16xbf16> to vector<1x8x16xbf16>
    %114 = tpu.concatenate %106, %107, %108, %109, %110, %111, %112, %113 in 0 : vector<1x8x16xbf16>, vector<1x8x16xbf16>, vector<1x8x16xbf16>, vector<1x8x16xbf16>, vector<1x8x16xbf16>, vector<1x8x16xbf16>, vector<1x8x16xbf16>, vector<1x8x16xbf16> -> vector<8x8x16xbf16>
    %115 = vector.extract_strided_slice %80 {offsets = [0, 0], sizes = [8, 16], strides = [1, 1]} : vector<16x64xbf16> to vector<8x16xbf16>
    %116 = vector.extract_strided_slice %80 {offsets = [0, 16], sizes = [8, 16], strides = [1, 1]} : vector<16x64xbf16> to vector<8x16xbf16>
    %117 = vector.extract_strided_slice %80 {offsets = [0, 32], sizes = [8, 16], strides = [1, 1]} : vector<16x64xbf16> to vector<8x16xbf16>
    %118 = vector.extract_strided_slice %80 {offsets = [0, 48], sizes = [8, 16], strides = [1, 1]} : vector<16x64xbf16> to vector<8x16xbf16>
    %119 = vector.extract_strided_slice %80 {offsets = [8, 0], sizes = [8, 16], strides = [1, 1]} : vector<16x64xbf16> to vector<8x16xbf16>
    %120 = vector.extract_strided_slice %80 {offsets = [8, 16], sizes = [8, 16], strides = [1, 1]} : vector<16x64xbf16> to vector<8x16xbf16>
    %121 = vector.extract_strided_slice %80 {offsets = [8, 32], sizes = [8, 16], strides = [1, 1]} : vector<16x64xbf16> to vector<8x16xbf16>
    %122 = vector.extract_strided_slice %80 {offsets = [8, 48], sizes = [8, 16], strides = [1, 1]} : vector<16x64xbf16> to vector<8x16xbf16>
    %123 = vector.shape_cast %115 : vector<8x16xbf16> to vector<1x8x16xbf16>
    %124 = vector.shape_cast %116 : vector<8x16xbf16> to vector<1x8x16xbf16>
    %125 = vector.shape_cast %117 : vector<8x16xbf16> to vector<1x8x16xbf16>
    %126 = vector.shape_cast %118 : vector<8x16xbf16> to vector<1x8x16xbf16>
    %127 = vector.shape_cast %119 : vector<8x16xbf16> to vector<1x8x16xbf16>
    %128 = vector.shape_cast %120 : vector<8x16xbf16> to vector<1x8x16xbf16>
    %129 = vector.shape_cast %121 : vector<8x16xbf16> to vector<1x8x16xbf16>
    %130 = vector.shape_cast %122 : vector<8x16xbf16> to vector<1x8x16xbf16>
    %131 = tpu.concatenate %123, %124, %125, %126, %127, %128, %129, %130 in 0 : vector<1x8x16xbf16>, vector<1x8x16xbf16>, vector<1x8x16xbf16>, vector<1x8x16xbf16>, vector<1x8x16xbf16>, vector<1x8x16xbf16>, vector<1x8x16xbf16>, vector<1x8x16xbf16> -> vector<8x8x16xbf16>
    "tpu.trace_start"() <{level = 10 : i32, message = "gqd,gkd->gqk"}> : () -> ()
    %cst_24 = arith.constant dense<0.000000e+00> : vector<8x8x8xf32>
    %132 = tpu.matmul %97, %114, %cst_24 {dimension_numbers = #tpu.dot_dimension_numbers<[2], [2], [1], [1], [0, 0, 0, 1, 1, 1], [0], [0]>} : vector<8x8x16xbf16>, vector<8x8x16xbf16>, vector<8x8x8xf32> -> vector<8x8x8xf32>
    "tpu.trace_stop"() : () -> ()
    %133 = tpu.iota {dimensions = array<i32: 1>} : vector<8x8xi32>
    %134 = tpu.iota {dimensions = array<i32: 0>} : vector<8x8xi32>
    %135 = arith.cmpi sgt, %133, %134 : vector<8x8xi32>
    %cst_25 = arith.constant -1.000000e+10 : f32
    %cst_26 = arith.constant 0.000000e+00 : f32
    %136 = vector.broadcast %cst_25 : f32 to vector<8x8xf32>
    %137 = vector.broadcast %cst_26 : f32 to vector<8x8xf32>
    %138 = arith.select %135, %136, %137 : vector<8x8xi1>, vector<8x8xf32>
    %c0_27 = arith.constant 0 : index
    %c0_28 = arith.constant 0 : index
    %c0_29 = arith.constant 0 : index
    %139 = vector.load %arg6[%c0_27, %c0_28, %c0_29] : memref<8x1x8xf32, #tpu.memory_space<vmem>>, vector<8x1x8xf32>
    %140 = vector.broadcast %139 : vector<8x1x8xf32> to vector<8x8x8xf32>
    %141 = arith.addf %132, %140 : vector<8x8x8xf32>
    %142 = vector.shape_cast %138 : vector<8x8xf32> to vector<1x8x8xf32>
    %143 = vector.broadcast %142 : vector<1x8x8xf32> to vector<8x8x8xf32>
    %144 = arith.addf %141, %143 : vector<8x8x8xf32>
    %cst_30 = arith.constant dense<0xFF800000> : vector<8x8xf32>
    %145 = vector.multi_reduction <maximumf>, %144, %cst_30 [2] : vector<8x8x8xf32> to vector<8x8xf32>
    %146 = vector.shape_cast %145 : vector<8x8xf32> to vector<8x8x1xf32>
    %147 = vector.broadcast %146 : vector<8x8x1xf32> to vector<8x8x8xf32>
    %148 = arith.subf %144, %147 : vector<8x8x8xf32>
    %149 = math.exp %148 : vector<8x8x8xf32>
    %cst_31 = arith.constant dense<0.000000e+00> : vector<8x8xf32>
    %150 = vector.multi_reduction <add>, %149, %cst_31 [2] : vector<8x8x8xf32> to vector<8x8xf32>
    %151 = vector.shape_cast %150 : vector<8x8xf32> to vector<8x8x1xf32>
    %152 = tpu.reciprocal %151 {approx = true} : vector<8x8x1xf32> -> vector<8x8x1xf32>
    %153 = vector.broadcast %152 : vector<8x8x1xf32> to vector<8x8x8xf32>
    %154 = arith.mulf %149, %153 : vector<8x8x8xf32>
    %155 = arith.truncf %154 : vector<8x8x8xf32> to vector<8x8x8xbf16>
    "tpu.trace_start"() <{level = 10 : i32, message = "gqk,gkd->gqd"}> : () -> ()
    %cst_32 = arith.constant dense<0.000000e+00> : vector<8x8x16xf32>
    %156 = tpu.matmul %155, %131, %cst_32 {dimension_numbers = #tpu.dot_dimension_numbers<[2], [1], [1], [2], [0, 0, 0, 1, 1, 2], [0], [0]>} : vector<8x8x8xbf16>, vector<8x8x16xbf16>, vector<8x8x16xf32> -> vector<8x8x16xf32>
    "tpu.trace_stop"() : () -> ()
    %157 = vector.extract_strided_slice %156 {offsets = [0, 0, 0], sizes = [1, 8, 16], strides = [1, 1, 1]} : vector<8x8x16xf32> to vector<1x8x16xf32>
    %158 = vector.shape_cast %157 : vector<1x8x16xf32> to vector<8x16xf32>
    %159 = vector.extract_strided_slice %156 {offsets = [1, 0, 0], sizes = [1, 8, 16], strides = [1, 1, 1]} : vector<8x8x16xf32> to vector<1x8x16xf32>
    %160 = vector.shape_cast %159 : vector<1x8x16xf32> to vector<8x16xf32>
    %161 = vector.extract_strided_slice %156 {offsets = [2, 0, 0], sizes = [1, 8, 16], strides = [1, 1, 1]} : vector<8x8x16xf32> to vector<1x8x16xf32>
    %162 = vector.shape_cast %161 : vector<1x8x16xf32> to vector<8x16xf32>
    %163 = vector.extract_strided_slice %156 {offsets = [3, 0, 0], sizes = [1, 8, 16], strides = [1, 1, 1]} : vector<8x8x16xf32> to vector<1x8x16xf32>
    %164 = vector.shape_cast %163 : vector<1x8x16xf32> to vector<8x16xf32>
    %165 = tpu.concatenate %158, %160, %162, %164 in 1 : vector<8x16xf32>, vector<8x16xf32>, vector<8x16xf32>, vector<8x16xf32> -> vector<8x64xf32>
    %166 = vector.extract_strided_slice %156 {offsets = [4, 0, 0], sizes = [1, 8, 16], strides = [1, 1, 1]} : vector<8x8x16xf32> to vector<1x8x16xf32>
    %167 = vector.shape_cast %166 : vector<1x8x16xf32> to vector<8x16xf32>
    %168 = vector.extract_strided_slice %156 {offsets = [5, 0, 0], sizes = [1, 8, 16], strides = [1, 1, 1]} : vector<8x8x16xf32> to vector<1x8x16xf32>
    %169 = vector.shape_cast %168 : vector<1x8x16xf32> to vector<8x16xf32>
    %170 = vector.extract_strided_slice %156 {offsets = [6, 0, 0], sizes = [1, 8, 16], strides = [1, 1, 1]} : vector<8x8x16xf32> to vector<1x8x16xf32>
    %171 = vector.shape_cast %170 : vector<1x8x16xf32> to vector<8x16xf32>
    %172 = vector.extract_strided_slice %156 {offsets = [7, 0, 0], sizes = [1, 8, 16], strides = [1, 1, 1]} : vector<8x8x16xf32> to vector<1x8x16xf32>
    %173 = vector.shape_cast %172 : vector<1x8x16xf32> to vector<8x16xf32>
    %174 = tpu.concatenate %167, %169, %171, %173 in 1 : vector<8x16xf32>, vector<8x16xf32>, vector<8x16xf32>, vector<8x16xf32> -> vector<8x64xf32>
    %175 = tpu.concatenate %165, %174 in 0 : vector<8x64xf32>, vector<8x64xf32> -> vector<16x64xf32>
    %176 = arith.negf %39 : vector<16x64xf32>
    %177 = math.exp %176 : vector<16x64xf32>
    %cst_33 = arith.constant 1.000000e+00 : f32
    %178 = vector.broadcast %cst_33 : f32 to vector<16x64xf32>
    %179 = arith.addf %178, %177 : vector<16x64xf32>
    %180 = arith.divf %178, %179 : vector<16x64xf32>
    %181 = arith.mulf %39, %180 : vector<16x64xf32>
    %182 = arith.mulf %181, %175 : vector<16x64xf32>
    %183 = arith.truncf %182 : vector<16x64xf32> to vector<16x64xbf16>
    %c0_34 = arith.constant 0 : index
    %c0_35 = arith.constant 0 : index
    %184 = vector.load %arg4[%c0_34, %c0_35] : memref<64x128xbf16, #tpu.memory_space<vmem>>, vector<64x128xbf16>
    %cst_36 = arith.constant dense<0.000000e+00> : vector<16x128xf32>
    %185 = tpu.matmul %183, %184, %cst_36 {dimension_numbers = #tpu.dot_dimension_numbers<[1], [0], [0], [1], [0, 0, 1, 1], [], []>} : vector<16x64xbf16>, vector<64x128xbf16>, vector<16x128xf32> -> vector<16x128xf32>
    %c2 = arith.constant 2 : index
    %c0_37 = arith.constant 0 : index
    %186 = vector.load %arg2[%c2, %c0_37] : memref<4x128xf32, #tpu.memory_space<vmem>>, vector<1x128xf32>
    %187 = vector.shape_cast %186 : vector<1x128xf32> to vector<128xf32>
    %c3 = arith.constant 3 : index
    %c0_38 = arith.constant 0 : index
    %188 = vector.load %arg2[%c3, %c0_38] : memref<4x128xf32, #tpu.memory_space<vmem>>, vector<1x128xf32>
    %189 = vector.shape_cast %188 : vector<1x128xf32> to vector<128xf32>
    %cst_39 = arith.constant dense<0.000000e+00> : vector<16xf32>
    %190 = vector.multi_reduction <add>, %185, %cst_39 [1] : vector<16x128xf32> to vector<16xf32>
    %191 = vector.shape_cast %190 : vector<16xf32> to vector<16x1xf32>
    %cst_40 = arith.constant 3.125000e-02 : f32
    %192 = vector.broadcast %cst_40 : f32 to vector<16x1xf32>
    %193 = arith.mulf %191, %192 : vector<16x1xf32>
    %194 = vector.broadcast %193 : vector<16x1xf32> to vector<16x128xf32>
    %195 = arith.subf %185, %194 : vector<16x128xf32>
    %196 = tpu.iota {dimensions = array<i32: 1>} : vector<16x128xi32>
    %c32_i32_41 = arith.constant 32 : i32
    %197 = vector.broadcast %c32_i32_41 : i32 to vector<16x128xi32>
    %198 = arith.cmpi slt, %196, %197 : vector<16x128xi32>
    %cst_42 = arith.constant 0.000000e+00 : f32
    %199 = vector.broadcast %cst_42 : f32 to vector<16x128xf32>
    %200 = arith.select %198, %195, %199 : vector<16x128xi1>, vector<16x128xf32>
    %201 = arith.mulf %200, %200 : vector<16x128xf32>
    %cst_43 = arith.constant dense<0.000000e+00> : vector<16xf32>
    %202 = vector.multi_reduction <add>, %201, %cst_43 [1] : vector<16x128xf32> to vector<16xf32>
    %203 = vector.shape_cast %202 : vector<16xf32> to vector<16x1xf32>
    %cst_44 = arith.constant 3.125000e-02 : f32
    %204 = vector.broadcast %cst_44 : f32 to vector<16x1xf32>
    %205 = arith.mulf %203, %204 : vector<16x1xf32>
    %cst_45 = arith.constant 9.99999974E-6 : f32
    %206 = vector.broadcast %cst_45 : f32 to vector<16x1xf32>
    %207 = arith.addf %205, %206 : vector<16x1xf32>
    %208 = math.rsqrt %207 : vector<16x1xf32>
    %209 = vector.broadcast %208 : vector<16x1xf32> to vector<16x128xf32>
    %210 = arith.mulf %200, %209 : vector<16x128xf32>
    %211 = vector.shape_cast %187 : vector<128xf32> to vector<1x128xf32>
    %212 = vector.broadcast %211 : vector<1x128xf32> to vector<16x128xf32>
    %213 = arith.mulf %210, %212 : vector<16x128xf32>
    %214 = vector.shape_cast %189 : vector<128xf32> to vector<1x128xf32>
    %215 = vector.broadcast %214 : vector<1x128xf32> to vector<16x128xf32>
    %216 = arith.addf %213, %215 : vector<16x128xf32>
    %217 = arith.addf %1, %216 : vector<16x128xf32>
    %218 = vector.shape_cast %217 : vector<16x128xf32> to vector<2x8x128xf32>
    %c0_46 = arith.constant 0 : index
    %c0_47 = arith.constant 0 : index
    %c0_48 = arith.constant 0 : index
    %219 = vector.load %arg7[%c0_46, %c0_47, %c0_48] : memref<2x8x128xf32, #tpu.memory_space<vmem>>, vector<2x8x128xf32>
    tpu.vector_store %arg7[%c0_46, %c0_47, %c0_48], %218 {strides = array<i32>} : memref<2x8x128xf32, #tpu.memory_space<vmem>>, vector<2x8x128xf32>,
    return
  }
  func.func @transform_0(%arg0: i32) -> (i32, i32, i32) {
    %c0_i32 = arith.constant 0 : i32
    %c0_i32_0 = arith.constant 0 : i32
    %c0_i32_1 = arith.constant 0 : i32
    return %arg0, %c0_i32, %c0_i32_0 : i32, i32, i32
  }
  func.func @transform_1(%arg0: i32) -> (i32, i32) {
    %c0_i32 = arith.constant 0 : i32
    %c0_i32_0 = arith.constant 0 : i32
    %c0_i32_1 = arith.constant 0 : i32
    return %c0_i32, %c0_i32_0 : i32, i32
  }
  func.func @transform_2(%arg0: i32) -> (i32, i32) {
    %c0_i32 = arith.constant 0 : i32
    %c0_i32_0 = arith.constant 0 : i32
    %c0_i32_1 = arith.constant 0 : i32
    return %c0_i32, %c0_i32_0 : i32, i32
  }
  func.func @transform_3(%arg0: i32) -> (i32, i32) {
    %c0_i32 = arith.constant 0 : i32
    %c0_i32_0 = arith.constant 0 : i32
    %c0_i32_1 = arith.constant 0 : i32
    return %c0_i32, %c0_i32_0 : i32, i32
  }
  func.func @transform_4(%arg0: i32) -> (i32, i32) {
    %c0_i32 = arith.constant 0 : i32
    %c0_i32_0 = arith.constant 0 : i32
    %c0_i32_1 = arith.constant 0 : i32
    return %c0_i32, %c0_i32_0 : i32, i32
  }
  func.func @transform_5(%arg0: i32) -> (i32, i32, i32) {
    %c0_i32 = arith.constant 0 : i32
    %c0_i32_0 = arith.constant 0 : i32
    %c0_i32_1 = arith.constant 0 : i32
    %c0_i32_2 = arith.constant 0 : i32
    return %c0_i32, %c0_i32_0, %c0_i32_1 : i32, i32, i32
  }
  func.func @transform_6(%arg0: i32) -> (i32, i32, i32) {
    %c0_i32 = arith.constant 0 : i32
    %c0_i32_0 = arith.constant 0 : i32
    %c0_i32_1 = arith.constant 0 : i32
    return %arg0, %c0_i32, %c0_i32_0 : i32, i32, i32
  }
}

</mosaic_0001>

<bundles_post_ra>
// kernel: transformer_forward.5
= control target key start
LH: loop header
LB: loop body
LE: loop exit
PB: predicated region body
PF: predicated region fallthrough
CT: control target
= control target key end

     0   :  { %s720_s15 = smov 0   ;;  %s722_s16 = smov 0   ;;  %s814_s0 = inlined_call_operand.vmem [shape: f32[4,8,128], index: 0, kind: input, shape index: {}]   ;;  %s815_s1 = inlined_call_operand.vmem [shape: f32[2,128], index: 1, kind: input, shape index: {}]   ;;  %s816_s2 = inlined_call_operand.vmem [shape: bf16[128,256], index: 2, kind: input, shape index: {}]   ;;  %s817_s3 = inlined_call_operand.vmem [shape: f32[1,256], index: 3, kind: input, shape index: {}]   ;;  %s818_s4 = inlined_call_operand.vmem [shape: f32[4,8,256], index: 4, kind: output, shape index: {}]  }
   0x1   :  { %s724_s17 = smov 0  }
   0x2 LB: > { %s26_s18 = sadd.s32 1, %s688_s16  ;;  %p590_p0 = scmp.ge.s32.totalorder %s692_s17, 1  ;;  %s692_s17 = sphi %s724_s17, %s14_s17   ;;  %s688_s16 = sphi %s722_s16, %s820_s16   ;;  %s684_s15 = sphi %s720_s15, %s819_s15  }
   0x3   : > { %p28_p1 = scmp.ge.s32.totalorder %s26_s18, 2  ;;  %p198_p2 = scmp.lt.s32.totalorder %s692_s17, 3 }
   0x5   : > { %s822_s18 = smov (%p28_p1, %s26_s18), 0  ;;  %p199_p3 = pnand %p590_p0, %p198_p2 }
   0x6   : > { %s591_s19 = sshll.u32 (!%p199_p3), %s684_s15, 1  ;;  %v642_v2 = vld [vmem:[%s816_s2 + $0x4] ss:$8 sps:$4 sm:$0xff] (!%p199_p3)   ;;  %v644_v3 = vld [vmem:[%s816_s2] ss:$8 sps:$4 sm:$0xff] (!%p199_p3)   ;;  %v284_v5 = vlaneseq (!%p199_p3)  ;;  %v694_v25 = vmov (!%p199_p3), 0  }
   0x7   : > { %202 = sbr.rel (%p199_p3) target bundleno = 554 (0x22a), region = 36  ;;  %p239_p4 = scmp.lt.s32.totalorder (!%p199_p3), %s591_s19, 3  ;;  %v645_v4 = vld [vmem:[%s816_s2 + $0x14] ss:$8 sps:$4 sm:$0xff] (!%p199_p3)   ;;  %426 = vmatprep.subr.bf16.mxu0 (!%p199_p3), %v642_v2  ;;  %v647_v17 = vld [vmem:[%s816_s2 + $0x10] ss:$8 sps:$4 sm:$0xff] (!%p199_p3)   ;;  %458 = vmatprep.mubr.bf16.mxu0 (!%p199_p3), %v694_v25 }
   0x8   : > { %427 = vmatpush1.bf16.msra.mxu0 (!%p199_p3), %v644_v3  ;;  %v285_v6 = vand.u32 (!%p199_p3), 127, %v284_v5  ;;  %v648_v18 = vld [vmem:[%s816_s2 + $0x24] ss:$8 sps:$4 sm:$0xff] (!%p199_p3)   ;;  %v650_v19 = vld [vmem:[%s816_s2 + $0x20] ss:$8 sps:$4 sm:$0xff] (!%p199_p3)   ;;  %v337_v48 = vshrl.u32 (!%p199_p3), %v284_v5, 7 }
   0x9   : > { %428 = vmatprep.subr.bf16.mxu0 (!%p199_p3), %v645_v4  ;;  %v651_v20 = vld [vmem:[%s816_s2 + $0x34] ss:$8 sps:$4 sm:$0xff] (!%p199_p3)   ;;  %v653_v21 = vld [vmem:[%s816_s2 + $0x30] ss:$8 sps:$4 sm:$0xff] (!%p199_p3)   ;;  %v654_v22 = vld [vmem:[%s816_s2 + $0x44] ss:$8 sps:$4 sm:$0xff] (!%p199_p3)  }
   0xa   : > { %vm286_vm0 = vcmp.lt.s32.totalorder (!%p199_p3), %v285_v6, 32  ;;  %v656_v23 = vld [vmem:[%s816_s2 + $0x40] ss:$8 sps:$4 sm:$0xff] (!%p199_p3)   ;;  %v657_v24 = vld [vmem:[%s816_s2 + $0x54] ss:$8 sps:$4 sm:$0xff] (!%p199_p3)   ;;  %v338_v49 = vsub.s32 (!%p199_p3), 0, %v337_v48 }
   0xb   : > { %v659_v26 = vld [vmem:[%s816_s2 + $0x50] ss:$8 sps:$4 sm:$0xff] (!%p199_p3)   ;;  %v660_v27 = vld [vmem:[%s816_s2 + $0x64] ss:$8 sps:$4 sm:$0xff] (!%p199_p3)   ;;  %v662_v28 = vld [vmem:[%s816_s2 + $0x60] ss:$8 sps:$4 sm:$0xff] (!%p199_p3)  }
   0xc   : > { %429 = vmatpush1.bf16.msra.mxu0 (!%p199_p3), %v647_v17  ;;  %v663_v29 = vld [vmem:[%s816_s2 + $0x74] ss:$8 sps:$4 sm:$0xff] (!%p199_p3)   ;;  %v665_v30 = vld [vmem:[%s816_s2 + $0x70] ss:$8 sps:$4 sm:$0xff] (!%p199_p3)   ;;  %v596_v39 = vld [vmem:[%s815_s1] ss:$0 sm:$0xff] (!%p199_p3) }
   0xd   : > { %430 = vmatprep.subr.bf16.mxu0 (!%p199_p3), %v648_v18  ;;  %v597_v43 = vld [vmem:[%s815_s1 + $0x1] ss:$0 sm:$0xff] (!%p199_p3)  ;;  %v342_v51 = vsub.s32 (!%p199_p3), 1, %v337_v48 }
   0xe   : > { %s824_s19 = smov (!%p239_p4, %s591_s19), 3  ;;  %v334_v50 = vld [vmem:[%s817_s3] sm:$0x3] }
   0xf   : > { %s592_s20 = sshll.u32 %s824_s19, 3  ;;  %s616_s14 = sshll.u32 %s824_s19, 4  ;;  %v339_v52 = vrot.slane %v334_v50, %v338_v49  ;;  %v343_v53 = vrot.slane %v334_v50, %v342_v51 }
  0x10   : > { %s242_s23 = scalar_lea.vmem %s814_s0, %s592_s20  ;;  %431 = vmatpush1.bf16.msra.mxu0 %v650_v19  ;;  %s264_s21 = scalar_lea.vmem %s818_s4, %s616_s14 }
  0x11   : > { %v272_v0 = vld [vmem:[%s242_s23] sm:$0xff]  ;;  %v273_v1 = vld [vmem:[%s242_s23 + $0x8] sm:$0xff]  ;;  %432 = vmatprep.subr.bf16.mxu0 %v651_v20 }
  0x12   : > { %276 = vadd.xlane.f32.xlu0 %v272_v0 }
  0x14   : > { %433 = vmatpush1.bf16.msra.mxu0 %v653_v21 }
  0x15   : > { %434 = vmatprep.subr.bf16.mxu0 %v654_v22 }
  0x16   : > { %278 = vadd.xlane.f32.xlu0 %v273_v1 }
  0x18   : > { %435 = vmatpush1.bf16.msra.mxu0 %v656_v23 }
  0x19   : > { %436 = vmatprep.subr.bf16.mxu0 %v657_v24 }
  0x1c   : > { %437 = vmatpush1.bf16.msra.mxu0 %v659_v26 }
  0x1d   : > { %438 = vmatprep.subr.bf16.mxu0 %v660_v27 }
  0x20   : > { %439 = vmatpush1.bf16.msra.mxu0 %v662_v28 }
  0x21   : > { %440 = vmatprep.subr.bf16.mxu0 %v663_v29 }
  0x24   : > { %441 = vmatpush1.bf16.msra.mxu0 %v665_v30 }
  0x9f   : > { %v277_v7 = vpop.xlane.xlu0 %276 }
  0xa0   : > { %v280_v8 = vmul.f32 0.03125, %v277_v7 }
  0xa2   : > { %v282_v9 = vsub.f32 %v272_v0, %v280_v8 }
  0xa3   : > { %v279_v10 = vpop.xlane.xlu0 %278 }
  0xa4   : > { %v281_v11 = vmul.f32 0.03125, %v279_v10  ;;  %v287_v12 = vsel %vm286_vm0, %v282_v9, 0.0 }
  0xa5   : > { %v289_v13 = vmul.f32 %v287_v12, %v287_v12 }
  0xa6   : > { %v283_v14 = vsub.f32 %v273_v1, %v281_v11 }
  0xa7   : > { %291 = vadd.xlane.f32.xlu1 %v289_v13 }
  0xa8   : > { %v288_v15 = vsel %vm286_vm0, %v283_v14, 0.0 }
  0xa9   : > { %v290_v16 = vmul.f32 %v288_v15, %v288_v15 }
  0xab   : > { %293 = vadd.xlane.f32.xlu1 %v290_v16 }
 0x134   : > { %v292_v31 = vpop.xlane.xlu1 %291 }
 0x135   : > { %v295_v32 = vmul.f32 0.03125, %v292_v31 }
 0x137   : > { %v297_v33 = vadd.f32 1e-05, %v295_v32 }
 0x138   : > { %v294_v34 = vpop.xlane.xlu1 %293 }
 0x139   : > { %666 = vrsqrt.f32 %v297_v33  ;;  %v296_v35 = vmul.f32 0.03125, %v294_v34 }
 0x13b   : > { %v298_v36 = vadd.f32 1e-05, %v296_v35 }
 0x13d   : > { %668 = vrsqrt.f32 %v298_v36 }
 0x143   : > { %v667_v37 = vpop.eup %666 }
 0x144   : > { %v301_v38 = vmul.f32 %v667_v37, %v287_v12 }
 0x146   : > { %v307_v42 = vmul.f32 %v596_v39, %v301_v38 }
 0x147   : > { %v669_v40 = vpop.eup %668 }
 0x148   : > { %v302_v41 = vmul.f32 %v669_v40, %v288_v15  ;;  %v313_v45 = vadd.f32 %v597_v43, %v307_v42 }
 0x14a   : > { %v308_v44 = vmul.f32 %v596_v39, %v302_v41 }
 0x14c   : > { %v314_v46 = vadd.f32 %v597_v43, %v308_v44 }
 0x14e   : > { %v315_v47 = vpack.c.bf16 %v314_v46, %v313_v45 }
 0x150   : > { %459 = vmatmul.mubr.bf16.vlgmr.msra.gmra.mrb[0].mxu0 %v315_v47 }
 0x223   : > { %v460_v54 = vpop.f32.mrb[0].mxu0 }
 0x224   : > { %v461_v55 = vadd.f32 %v460_v54, %v339_v52  ;;  %v462_v56 = vpop.f32.mrb[1].mxu0 }
 0x225   : > { %v463_v57 = vadd.f32 %v462_v56, %v343_v53  ;;  %v464_v58 = vpop.f32.mrb[2].mxu0 }
 0x226   : > { %469 = vst [vmem:[%s264_s21] sm:$0xff] %v461_v55  ;;  %v465_v59 = vadd.f32 %v464_v58, %v339_v52  ;;  %v466_v60 = vpop.f32.mrb[3].mxu0 }
 0x227   : > { %470 = vst [vmem:[%s264_s21 + $0x8] sm:$0xff] %v463_v57  ;;  %v467_v61 = vadd.f32 %v466_v60, %v343_v53 }
 0x228   : > { %471 = vst [vmem:[%s264_s21 + $0x10] sm:$0xff] %v465_v59 }
 0x229   : > { %472 = vst [vmem:[%s264_s21 + $0x18] sm:$0xff] %v467_v61 }
 0x22a PF: > { %s14_s17 = sadd.s32 1, %s692_s17   ;;  %s819_s15 = smov %s688_s16 }
 0x22b   : > { %p11_p5 = scmp.ge.s32.totalorder %s14_s17, 4   ;;  %s820_s16 = smov %s822_s18 }
 0x22d   :  { %13 = sbr.rel (!%p11_p5) target bundleno = 2 (0x2), region = 76 }

// kernel: transformer_forward.3
= control target key start
LH: loop header
LB: loop body
LE: loop exit
PB: predicated region body
PF: predicated region fallthrough
CT: control target
= control target key end

     0   :  { %s2043_s21 = smov 0   ;;  %s2395_s0 = inlined_call_operand.vmem [shape: f32[4,8,128], index: 0, kind: input, shape index: {}, may-alias: {0,6}]   ;;  %s2396_s1 = inlined_call_operand.vmem [shape: f32[4,128], index: 1, kind: input, shape index: {}]   ;;  %s2397_s2 = inlined_call_operand.vmem [shape: bf16[128,256], index: 2, kind: input, shape index: {}]   ;;  %s2398_s3 = inlined_call_operand.vmem [shape: bf16[64,128], index: 3, kind: input, shape index: {}]   ;;  %s2399_s4 = inlined_call_operand.vmem [shape: f32[2,64], index: 4, kind: input, shape index: {}]   ;;  %s2400_s5 = inlined_call_operand.vmem [shape: f32[8,1,8], index: 5, kind: input, shape index: {}]   ;;  %s2401_s6 = inlined_call_operand.vmem [shape: f32[4,8,128], index: 6, kind: output, shape index: {}, may-alias: {0,6}]  }
   0x1 LB: > { %s1687_s22 = sadd.s32 4294967295, %s1996_s21   ;;  %p1691_p0 = scmp.ge.s32.totalorder %s1996_s21, 1  ;;  %s1996_s21 = sphi %s2043_s21, %s16_s21  }
   0x2   : > { %p213_p1 = scmp.lt.s32.totalorder %s1996_s21, 3 }
   0x4   : > { %p214_p2 = pnand %p1691_p0, %p213_p1 }
   0x5   : > { %s1692_s23 = sshll.u32 (!%p214_p2), %s1687_s22, 1  ;;  %v1998_v2 = vmov (!%p214_p2), 0.0   ;;  %v1913_v3 = vld [vmem:[%s2397_s2 + $0x4] ss:$8 sps:$4 sm:$0xff] (!%p214_p2)   ;;  %v1915_v4 = vld [vmem:[%s2397_s2] ss:$8 sps:$4 sm:$0xff] (!%p214_p2)   ;;  %v268_v6 = vlaneseq (!%p214_p2) }
   0x6   : > { %217 = sbr.rel (%p214_p2) target bundleno = 2507 (0x9cb), region = 44  ;;  %p244_p3 = scmp.lt.s32.totalorder (!%p214_p2), %s1692_s23, 3  ;;  %1787 = vmatprep.subr.bf16.mxu1 (!%p214_p2), %v1998_v2  ;;  %v1916_v5 = vld [vmem:[%s2397_s2 + $0x14] ss:$8 sps:$4 sm:$0xff] (!%p214_p2)   ;;  %396 = vmatprep.subr.bf16.mxu0 (!%p214_p2), %v1913_v3  ;;  %v1918_v18 = vld [vmem:[%s2397_s2 + $0x10] ss:$8 sps:$4 sm:$0xff] (!%p214_p2)  }
   0x7   : > { %397 = vmatpush1.bf16.msra.mxu0 (!%p214_p2), %v1915_v4  ;;  %v2077_v7 = vand.u32 (!%p214_p2), 127, %v268_v6  ;;  %v1919_v19 = vld [vmem:[%s2397_s2 + $0x24] ss:$8 sps:$4 sm:$0xff] (!%p214_p2)   ;;  %v1921_v20 = vld [vmem:[%s2397_s2 + $0x20] ss:$8 sps:$4 sm:$0xff] (!%p214_p2)   ;;  %v1999_v26 = vmov (!%p214_p2), 0  }
   0x8   : > { %398 = vmatprep.subr.bf16.mxu0 (!%p214_p2), %v1916_v5  ;;  %v1922_v21 = vld [vmem:[%s2397_s2 + $0x34] ss:$8 sps:$4 sm:$0xff] (!%p214_p2)   ;;  %v1924_v22 = vld [vmem:[%s2397_s2 + $0x30] ss:$8 sps:$4 sm:$0xff] (!%p214_p2)   ;;  %v1925_v23 = vld [vmem:[%s2397_s2 + $0x44] ss:$8 sps:$4 sm:$0xff] (!%p214_p2)   ;;  %428 = vmatprep.mubr.bf16.mxu0 (!%p214_p2), %v1999_v26 }
   0x9   : > { %vm270_vm0 = vcmp.lt.s32.totalorder (!%p214_p2), %v2077_v7, 32  ;;  %v1927_v24 = vld [vmem:[%s2397_s2 + $0x40] ss:$8 sps:$4 sm:$0xff] (!%p214_p2)   ;;  %v1928_v25 = vld [vmem:[%s2397_s2 + $0x54] ss:$8 sps:$4 sm:$0xff] (!%p214_p2)   ;;  %s2000_s25 = smov (!%p214_p2), 64  }
   0xa   : > { %v1930_v27 = vld [vmem:[%s2397_s2 + $0x50] ss:$8 sps:$4 sm:$0xff] (!%p214_p2)   ;;  %v1931_v28 = vld [vmem:[%s2397_s2 + $0x64] ss:$8 sps:$4 sm:$0xff] (!%p214_p2)   ;;  %v1933_v29 = vld [vmem:[%s2397_s2 + $0x60] ss:$8 sps:$4 sm:$0xff] (!%p214_p2)  }
   0xb   : > { %399 = vmatpush1.bf16.msra.mxu0 (!%p214_p2), %v1918_v18  ;;  %v1934_v30 = vld [vmem:[%s2397_s2 + $0x74] ss:$8 sps:$4 sm:$0xff] (!%p214_p2)   ;;  %v1936_v31 = vld [vmem:[%s2397_s2 + $0x70] ss:$8 sps:$4 sm:$0xff] (!%p214_p2)   ;;  %v1696_v40 = vld [vmem:[%s2396_s1] ss:$0 sm:$0xff] (!%p214_p2) }
   0xc   : > { %400 = vmatprep.subr.bf16.mxu0 (!%p214_p2), %v1919_v19  ;;  %v1697_v44 = vld [vmem:[%s2396_s1 + $0x1] ss:$0 sm:$0xff] (!%p214_p2)  ;;  %vm2001_vm1 = vmmov (!%p214_p2), 0   ;;  %v2149_v58 = vshrl.u32 (!%p214_p2), %v268_v6, 7  ;;  %v483_v59 = vld [vmem:[%s2399_s4] sm:$0x1] (!%p214_p2) }
   0xd   : > { %s2403_s23 = smov (!%p244_p3, %s1692_s23), 3  ;;  %v1714_v50 = vld [vmem:[%s2399_s4 + $0x1] ss:$0 sm:$0xff]  ;;  %1789 = vmatprep.mubr.msk.bf16.mxu1 %vm2001_vm1, %v1998_v2  ;;  %v484_v61 = vsub.f32 1.0, %v483_v59  ;;  %vm609_vm5 = vcmask 130048   ;;  %s2002_s29 = smov 96  }
   0xe   : > { %s1693_s24 = sshll.u32 %s2403_s23, 3  ;;  %v454_v60 = vadd.s32 8, %v2149_v58  ;;  %v487_v62 = vsub.s32 0, %v2149_v58  ;;  %v459_v63 = vand.u32 7, %v2149_v58  ;;  %vm451_vm2 = vcmp.lt.s32.totalorder %v2149_v58, 1  ;;  %s2003_s30 = smov 112  }
   0xf   : > { %s2059_s27 = scalar_lea.vmem %s2395_s0, %s1693_s24  ;;  %401 = vmatpush1.bf16.msra.mxu0 %v1921_v20  ;;  %s2004_s7 = smov 80   ;;  %vm1086_vm6 = vcmask 1043456   ;;  %vm551_vm7 = vcmp.gt.s32.totalorder %v2077_v7, %v2149_v58  ;;  %vm986_vm8 = vcmask 64512   ;;  %vm1465_vm9 = vcmask 261120  }
  0x10   : > { %v256_v0 = vld [vmem:[%s2059_s27] sm:$0xff]  ;;  %v2063_v1 = vld [vmem:[%s2059_s27 + $0x8] sm:$0xff]  ;;  %402 = vmatprep.subr.bf16.mxu0 %v1922_v21  ;;  %v488_v4 = vrot.slane %v484_v61, %v487_v62  ;;  %v494_v5 = vrot.slane %v483_v59, %v487_v62  ;;  %vm479_vm3 = vcmp.eq.s32.totalorder %v459_v63, 0  ;;  %vm1467_vm10 = vcmask 392192   ;;  %s253_s22 = scalar_lea.vmem %s2401_s6, %s1693_s24 }
  0x11   : > { %260 = vadd.xlane.f32.xlu0 %v256_v0  ;;  %vm1544_vm11 = vcmask 523264  }
  0x13   : > { %403 = vmatpush1.bf16.msra.mxu0 %v1924_v22 }
  0x14   : > { %404 = vmatprep.subr.bf16.mxu0 %v1925_v23 }
  0x15   : > { %262 = vadd.xlane.f32.xlu0 %v2063_v1 }
  0x17   : > { %405 = vmatpush1.bf16.msra.mxu0 %v1927_v24 }
  0x18   : > { %406 = vmatprep.subr.bf16.mxu0 %v1928_v25 }
  0x1b   : > { %407 = vmatpush1.bf16.msra.mxu0 %v1930_v27 }
  0x1c   : > { %408 = vmatprep.subr.bf16.mxu0 %v1931_v28 }
  0x1f   : > { %409 = vmatpush1.bf16.msra.mxu0 %v1933_v29 }
  0x20   : > { %410 = vmatprep.subr.bf16.mxu0 %v1934_v30 }
  0x23   : > { %411 = vmatpush1.bf16.msra.mxu0 %v1936_v31 }
  0x24   : > { %1823 = vmatprep.subr.bf16.mxu0 %v1998_v2 }
  0x9e   : > { %v261_v8 = vpop.xlane.xlu0 %260 }
  0x9f   : > { %v264_v9 = vmul.f32 0.03125, %v261_v8 }
  0xa1   : > { %v266_v10 = vsub.f32 %v256_v0, %v264_v9  ;;  %v466_v0 = vand.u32 7, %v454_v60 }
  0xa2   : > { %v263_v11 = vpop.xlane.xlu0 %262 }
  0xa3   : > { %v265_v12 = vmul.f32 0.03125, %v263_v11  ;;  %v271_v13 = vsel %vm270_vm0, %v266_v10, 0.0  ;;  %vm480_vm4 = vcmp.eq.s32.totalorder %v466_v0, 0  ;;  %v1717_v0 = vld [vmem:[%s2400_s5 + $0x2] ss:$0 sm:$0xff] }
  0xa4   : > { %v273_v14 = vmul.f32 %v271_v13, %v271_v13 }
  0xa5   : > { %v267_v15 = vsub.f32 %v2063_v1, %v265_v12 }
  0xa6   : > { %275 = vadd.xlane.f32.xlu1 %v273_v14 }
  0xa7   : > { %v272_v16 = vsel %vm270_vm0, %v267_v15, 0.0 }
  0xa8   : > { %v274_v17 = vmul.f32 %v272_v16, %v272_v16 }
  0xaa   : > { %277 = vadd.xlane.f32.xlu1 %v274_v17 }
 0x133   : > { %v276_v32 = vpop.xlane.xlu1 %275 }
 0x134   : > { %v279_v33 = vmul.f32 0.03125, %v276_v32 }
 0x136   : > { %v281_v34 = vadd.f32 1e-05, %v279_v33 }
 0x137   : > { %v278_v35 = vpop.xlane.xlu1 %277 }
 0x138   : > { %1941 = vrsqrt.f32 %v281_v34  ;;  %v280_v36 = vmul.f32 0.03125, %v278_v35 }
 0x13a   : > { %v282_v37 = vadd.f32 1e-05, %v280_v36 }
 0x13c   : > { %1943 = vrsqrt.f32 %v282_v37 }
 0x142   : > { %v1942_v38 = vpop.eup %1941 }
 0x143   : > { %v285_v39 = vmul.f32 %v1942_v38, %v271_v13 }
 0x145   : > { %v291_v43 = vmul.f32 %v1696_v40, %v285_v39 }
 0x146   : > { %v1944_v41 = vpop.eup %1943 }
 0x147   : > { %v286_v42 = vmul.f32 %v1944_v41, %v272_v16  ;;  %v297_v46 = vadd.f32 %v1697_v44, %v291_v43 }
 0x149   : > { %v292_v45 = vmul.f32 %v1696_v40, %v286_v42 }
 0x14b   : > { %v298_v47 = vadd.f32 %v1697_v44, %v292_v45  ;;  %v1715_v44 = vld [vmem:[%s2400_s5] ss:$0 sm:$0xff]  ;;  %v2219_v45 = vsel %vm551_vm7, -1e+10, %v1998_v2 }
 0x14d   : > { %v299_v48 = vpack.c.bf16 %v298_v47, %v297_v46 }
 0x14f   : > { %429 = vmatmul.mubr.bf16.vlgmr.msra.gmra.mrb[0].mxu0 %v299_v48 }
 0x150   : > { %1825 = vmatprep.mubr.msk.bf16.mxu0 %vm2001_vm1, %v1998_v2 }
 0x222   : > { %v430_v49 = vpop.f32.mrb[0].mxu0 }
 0x223   : > { %441 = vrot.lane.b32.xlu0 %v430_v49, %s2000_s25  ;;  %v2135_v51 = vpop.f32.mrb[1].mxu0  ;;  %v504_v53 = vmul.f32 %v1714_v50, %v430_v49 }
 0x224   : > { %v434_v52 = vpop.f32.mrb[2].mxu0 }
 0x225   : > { %v505_v54 = vmul.f32 %v1714_v50, %v434_v52  ;;  %443 = vrot.lane.b32.xlu1 %v434_v52, %s2000_s25  ;;  %v2138_v55 = vpop.f32.mrb[3].mxu0 }
 0x226   : > { %v2142_v56 = vpack.c.bf16 %v2138_v55, %v2135_v51 }
 0x227   : > { %v506_v57 = vpack.c.bf16 %v505_v54, %v504_v53  ;;  %v1716_v54 = vld [vmem:[%s2400_s5 + $0x1] ss:$0 sm:$0xff] }
 0x228   : > { %v1088_v39 = vsel %vm1086_vm6, %v2142_v56, 0 }
 0x229   : > { %v516_v23 = vrot.slane %v506_v57, 4 }
 0x295   : > { %v442_v3 = vpop.permute.xlu0 %441 }
 0x296   : > { %v447_v6 = vrot.slane %v442_v3, 7  ;;  %v489_v14 = vmul.f32 %v488_v4, %v442_v3 }
 0x297   : > { %v444_v8 = vpop.permute.xlu1 %443 }
 0x298   : > { %v448_v9 = vrot.slane %v444_v8, 7  ;;  %v490_v15 = vmul.f32 %v488_v4, %v444_v8 }
 0x29a   : > { %v452_v10 = vsel %vm451_vm2, %v447_v6, %v448_v9  ;;  %v453_v11 = vsel %vm451_vm2, %v448_v9, %v447_v6 }
 0x29b   : > { %v481_v12 = vsel %vm479_vm3, 0.0, %v453_v11  ;;  %v482_v13 = vsel %vm480_vm4, 0.0, %v452_v10  ;;  %v1718_v11 = vld [vmem:[%s2400_s5 + $0x3] ss:$0 sm:$0xff] }
 0x29c   : > { %v495_v16 = vmul.f32 %v494_v5, %v481_v12  ;;  %v496_v17 = vmul.f32 %v494_v5, %v482_v13 }
 0x29e   : > { %v497_v18 = vadd.f32 %v495_v16, %v489_v14  ;;  %v498_v19 = vadd.f32 %v496_v17, %v490_v15 }
 0x2a0   : > { %v507_v20 = vpack.c.bf16 %v498_v19, %v497_v18 }
 0x2a2   : > { %526 = vrot.lane.b32.xlu0 %v507_v20, %s2002_s29  ;;  %524 = vrot.lane.b32.xlu1 %v507_v20, %s2003_s30  ;;  %v614_v21 = vsel %vm609_vm5, %v507_v20, 0  ;;  %v530_v22 = vrot.slane %v507_v20, 4 }
 0x2a3   : > { %1788 = vmatpush3.bf16.xpose.msra.mxu1 %v614_v21 }
 0x2a4   : > { %1793 = vmatprep.subr.bf16.mxu1 %v1998_v2  ;;  %v798_v38 = vsel %vm609_vm5, %v530_v22, 0 }
 0x2a6   : > { %528 = vrot.lane.b32.xlu0 %v507_v20, %s2004_s7  ;;  %510 = vrot.lane.b32.xlu1 %v506_v57, %s2003_s30 }
 0x2aa   : > { %531 = vrot.lane.b32.xlu0 %v530_v22, %s2003_s30  ;;  %512 = vrot.lane.b32.xlu1 %v506_v57, %s2002_s29 }
 0x2ab   : > { %1790 = vmatmul.mubr.msk.bf16.vlgmr.msra.gmra.mrb[0].mxu1 %vm609_vm5, %v506_v57 }
 0x2ac   : > { %1795 = vmatprep.mubr.msk.bf16.mxu1 %vm2001_vm1, %v1998_v2 }
 0x2ae   : > { %514 = vrot.lane.b32.xlu1 %v506_v57, %s2004_s7  ;;  %517 = vrot.lane.b32.xlu0 %v516_v23, %s2003_s30 }
 0x2b2   : > { %533 = vrot.lane.b32.xlu1 %v530_v22, %s2002_s29  ;;  %519 = vrot.lane.b32.xlu0 %v516_v23, %s2002_s29 }
 0x2b6   : > { %535 = vrot.lane.b32.xlu1 %v530_v22, %s2004_s7 }
 0x2ba   : > { %521 = vrot.lane.b32.xlu1 %v516_v23, %s2004_s7 }
 0x314   : > { %v527_v24 = vpop.permute.xlu0 %526  ;;  %v525_v25 = vpop.permute.xlu1 %524 }
 0x315   : > { %v660_v26 = vsel %vm609_vm5, %v525_v25, 0  ;;  %v706_v30 = vsel %vm609_vm5, %v527_v24, 0  ;;  %v1719_v24 = vld [vmem:[%s2400_s5 + $0x4] ss:$0 sm:$0xff] }
 0x316   : > { %1794 = vmatpush3.bf16.xpose.msra.mxu1 %v660_v26 }
 0x317   : > { %1799 = vmatprep.subr.bf16.mxu1 %v1998_v2 }
 0x318   : > { %v511_v27 = vpop.permute.xlu1 %510  ;;  %v529_v28 = vpop.permute.xlu0 %528 }
 0x319   : > { %v752_v34 = vsel %vm609_vm5, %v529_v28, 0 }
 0x31c   : > { %v513_v29 = vpop.permute.xlu1 %512  ;;  %v532_v31 = vpop.permute.xlu0 %531 }
 0x31d   : > { %1796 = vmatmul.mubr.msk.bf16.vlgmr.msra.gmra.mrb[4].mxu1 %vm609_vm5, %v511_v27  ;;  %v844_v40 = vsel %vm609_vm5, %v532_v31, 0 }
 0x31e   : > { %1800 = vmatpush3.bf16.xpose.msra.mxu1 %v706_v30  ;;  %1801 = vmatprep.mubr.msk.bf16.mxu1 %vm2001_vm1, %v1998_v2 }
 0x31f   : > { %1805 = vmatprep.subr.bf16.mxu1 %v1998_v2 }
 0x320   : > { %v515_v32 = vpop.permute.xlu1 %514  ;;  %v518_v36 = vpop.permute.xlu0 %517 }
 0x324   : > { %v534_v33 = vpop.permute.xlu1 %533  ;;  %v520_v37 = vpop.permute.xlu0 %519 }
 0x325   : > { %v890_v35 = vsel %vm609_vm5, %v534_v33, 0  ;;  %1802 = vmatmul.mubr.msk.bf16.vlgmr.msra.gmra.mrb[8].mxu1 %vm609_vm5, %v513_v29 }
 0x326   : > { %1806 = vmatpush3.bf16.xpose.msra.mxu1 %v752_v34  ;;  %1824 = vmatpush3.bf16.xpose.msra.mxu0 %v890_v35  ;;  %v1720_v34 = vld [vmem:[%s2400_s5 + $0x5] ss:$0 sm:$0xff] }
 0x327   : > { %1807 = vmatprep.mubr.msk.bf16.mxu1 %vm2001_vm1, %v1998_v2  ;;  %1811 = vmatprep.subr.bf16.mxu1 %v1998_v2 }
 0x328   : > { %1835 = vmatprep.subr.bf16.mxu0 %v1998_v2  ;;  %v536_v41 = vpop.permute.xlu1 %535 }
 0x329   : > { %v936_v42 = vsel %vm609_vm5, %v536_v41, 0 }
 0x32c   : > { %v522_v43 = vpop.permute.xlu1 %521 }
 0x32d   : > { %1808 = vmatmul.mubr.msk.bf16.vlgmr.msra.gmra.mrb[12].mxu1 %vm609_vm5, %v515_v32  ;;  %1826 = vmatmul.mubr.msk.bf16.vlgmr.msra.gmra.mrb[4].mxu0 %vm609_vm5, %v520_v37 }
 0x32e   : > { %1812 = vmatpush3.bf16.xpose.msra.mxu1 %v798_v38  ;;  %1836 = vmatpush3.bf16.msra.mxu0 %v1088_v39 }
 0x32f   : > { %1813 = vmatprep.mubr.msk.bf16.mxu1 %vm2001_vm1, %v1998_v2  ;;  %1817 = vmatprep.subr.bf16.mxu1 %v1998_v2 }
 0x330   : > { %1837 = vmatprep.mubr.msk.bf16.mxu0 %vm2001_vm1, %v1998_v2  ;;  %1847 = vmatprep.subr.bf16.mxu0 %v1998_v2 }
 0x335   : > { %1814 = vmatmul.mubr.msk.bf16.vlgmr.msra.gmra.mrb[16].mxu1 %vm609_vm5, %v516_v23  ;;  %v1721_v23 = vld [vmem:[%s2400_s5 + $0x6] ss:$0 sm:$0xff] }
 0x336   : > { %1818 = vmatpush3.bf16.xpose.msra.mxu1 %v844_v40  ;;  %1819 = vmatprep.mubr.msk.bf16.mxu1 %vm2001_vm1, %v1998_v2 }
 0x337   : > { %1829 = vmatprep.subr.bf16.mxu1 %v1998_v2 }
 0x33d   : > { %1820 = vmatmul.mubr.msk.bf16.vlgmr.msra.gmra.mrb[20].mxu1 %vm609_vm5, %v518_v36 }
 0x33e   : > { %1830 = vmatpush3.bf16.xpose.msra.mxu1 %v936_v42  ;;  %1831 = vmatprep.mubr.msk.bf16.mxu1 %vm2001_vm1, %v1998_v2 }
 0x33f   : > { %1841 = vmatprep.subr.bf16.mxu1 %v1998_v2 }
 0x345   : > { %1832 = vmatmul.mubr.msk.bf16.vlgmr.msra.gmra.mrb[24].mxu1 %vm609_vm5, %v522_v43 }
 0x346   : > { %1843 = vmatprep.mubr.msk.bf16.mxu1 %vm2001_vm1, %v1998_v2 }
 0x37e   : > { %v650_v46 = vpop.f32.mrb[0].mxu1 }
 0x37f   : > { %v651_v47 = vadd.f32 %v1715_v44, %v650_v46  ;;  %v1791_v48 = vpop.f32.mrb[1].mxu1 }
 0x380   : > { %v653_v49 = vpop.f32.mrb[2].mxu1 }
 0x381   : > { %v1792_v50 = vpop.f32.mrb[3].mxu1  ;;  %v978_v52 = vadd.f32 %v651_v47, %v2219_v45  ;;  %v1722_v47 = vld [vmem:[%s2400_s5 + $0x7] ss:$0 sm:$0xff] }
 0x383   : > { %v987_v53 = vsel %vm986_vm8, %v978_v52, -inf }
 0x384   : > { %988 = vmax.xlane.f32.xlu0 %v987_v53 }
 0x3f0   : > { %v696_v57 = vpop.f32.mrb[4].mxu1 }
 0x3f1   : > { %v697_v58 = vadd.f32 %v1716_v54, %v696_v57  ;;  %v1797_v59 = vpop.f32.mrb[5].mxu1 }
 0x3f2   : > { %v699_v60 = vpop.f32.mrb[6].mxu1 }
 0x3f3   : > { %v1798_v61 = vpop.f32.mrb[7].mxu1  ;;  %v2227_v62 = vadd.f32 %v697_v58, %v2219_v45 }
 0x3f5   : > { %v990_v63 = vsel %vm986_vm8, %v2227_v62, -inf }
 0x3f6   : > { %991 = vmax.xlane.f32.xlu1 %v990_v63 }
 0x3f8   : > { %v742_v3 = vpop.f32.mrb[8].mxu1 }
 0x3f9   : > { %v743_v4 = vadd.f32 %v1717_v0, %v742_v3  ;;  %v1803_v5 = vpop.f32.mrb[9].mxu1 }
 0x3fa   : > { %v745_v8 = vpop.f32.mrb[10].mxu1 }
 0x3fb   : > { %v1804_v6 = vpop.f32.mrb[11].mxu1  ;;  %v2235_v9 = vadd.f32 %v743_v4, %v2219_v45 }
 0x3fd   : > { %v993_v10 = vsel %vm986_vm8, %v2235_v9, -inf }
 0x3fe   : > { %994 = vmax.xlane.f32.xlu0 %v993_v10 }
 0x400   : > { %v788_v12 = vpop.f32.mrb[12].mxu1  ;;  %v926_v13 = vpop.f32.mrb[4].mxu0 }
 0x401   : > { %v789_v14 = vadd.f32 %v1718_v11, %v788_v12  ;;  %v1809_v15 = vpop.f32.mrb[13].mxu1  ;;  %v1827_v16 = vpop.f32.mrb[5].mxu0  ;;  %v927_v26 = vadd.f32 %v1721_v23, %v926_v13 }
 0x402   : > { %v791_v17 = vpop.f32.mrb[14].mxu1  ;;  %v929_v18 = vpop.f32.mrb[6].mxu0 }
 0x403   : > { %v1810_v19 = vpop.f32.mrb[15].mxu1  ;;  %v1828_v20 = vpop.f32.mrb[7].mxu0  ;;  %v981_v21 = vadd.f32 %v789_v14, %v2219_v45  ;;  %v984_v33 = vadd.f32 %v927_v26, %v2219_v45 }
 0x405   : > { %v996_v22 = vsel %vm986_vm8, %v981_v21, -inf  ;;  %v1005_v39 = vsel %vm986_vm8, %v984_v33, -inf }
 0x406   : > { %997 = vmax.xlane.f32.xlu0 %v996_v22 }
 0x408   : > { %v834_v25 = vpop.f32.mrb[16].mxu1 }
 0x409   : > { %v835_v27 = vadd.f32 %v1719_v24, %v834_v25  ;;  %v1815_v28 = vpop.f32.mrb[17].mxu1  ;;  %v544_v25 = vrot.slane %v2142_v56, 4 }
 0x40a   : > { %v837_v29 = vpop.f32.mrb[18].mxu1 }
 0x40b   : > { %v1816_v30 = vpop.f32.mrb[19].mxu1  ;;  %v982_v31 = vadd.f32 %v835_v27, %v2219_v45 }
 0x40d   : > { %v999_v32 = vsel %vm986_vm8, %v982_v31, -inf }
 0x40e   : > { %1000 = vmax.xlane.f32.xlu0 %v999_v32 }
 0x410   : > { %v880_v35 = vpop.f32.mrb[20].mxu1 }
 0x411   : > { %v989_v36 = vpop.xlane.xlu0 %988  ;;  %v881_v37 = vadd.f32 %v1720_v34, %v880_v35  ;;  %v1821_v38 = vpop.f32.mrb[21].mxu1 }
 0x412   : > { %v1011_v40 = vsub.f32 %v978_v52, %v989_v36  ;;  %v883_v41 = vpop.f32.mrb[22].mxu1  ;;  %1006 = vmax.xlane.f32.xlu0 %v1005_v39 }
 0x413   : > { %v1822_v42 = vpop.f32.mrb[23].mxu1  ;;  %v2258_v43 = vadd.f32 %v881_v37, %v2219_v45 }
 0x414   : > { %v1019_v44 = vmul.f32 1.442695, %v1011_v40 }
 0x415   : > { %v1002_v46 = vsel %vm986_vm8, %v2258_v43, -inf }
 0x416   : > { %1945 = vpow2.f32 %v1019_v44  ;;  %1003 = vmax.xlane.f32.xlu1 %v1002_v46 }
 0x418   : > { %v972_v48 = vpop.f32.mrb[24].mxu1 }
 0x419   : > { %v973_v49 = vadd.f32 %v1722_v47, %v972_v48  ;;  %v1833_v50 = vpop.f32.mrb[25].mxu1 }
 0x41a   : > { %v975_v52 = vpop.f32.mrb[26].mxu1 }
 0x41b   : > { %v1834_v53 = vpop.f32.mrb[27].mxu1  ;;  %v985_v54 = vadd.f32 %v973_v49, %v2219_v45 }
 0x41d   : > { %v1008_v57 = vsel %vm986_vm8, %v985_v54, -inf }
 0x41e   : > { %1009 = vmax.xlane.f32.xlu1 %v1008_v57 }
 0x420   : > { %v1946_v58 = vpop.eup %1945 }
 0x421   : > { %v1035_v59 = vsel %vm986_vm8, %v1946_v58, 0.0 }
 0x422   : > { %1036 = vadd.xlane.f32.xlu0 %v1035_v59 }
 0x483   : > { %v992_v60 = vpop.xlane.xlu1 %991 }
 0x484   : > { %v1012_v61 = vsub.f32 %v2227_v62, %v992_v60 }
 0x486   : > { %v1021_v63 = vmul.f32 1.442695, %v1012_v61  ;;  %v1272_v61 = vsel %vm1086_vm6, %v544_v25, 0 }
 0x488   : > { %1947 = vpow2.f32 %v1021_v63 }
 0x48b   : > { %v995_v0 = vpop.xlane.xlu0 %994 }
 0x48c   : > { %v1013_v10 = vsub.f32 %v2235_v9, %v995_v0 }
 0x48e   : > { %v1023_v62 = vmul.f32 1.442695, %v1013_v10 }
 0x492   : > { %v2269_v3 = vpop.eup %1947 }
 0x493   : > { %v998_v4 = vpop.xlane.xlu0 %997  ;;  %v1038_v5 = vsel %vm986_vm8, %v2269_v3, 0.0 }
 0x494   : > { %v1014_v45 = vsub.f32 %v981_v21, %v998_v4  ;;  %1039 = vadd.xlane.f32.xlu1 %v1038_v5 }
 0x496   : > { %v1025_v8 = vmul.f32 1.442695, %v1014_v45 }
 0x498   : > { %1949 = vpow2.f32 %v1025_v8 }
 0x49b   : > { %v1001_v6 = vpop.xlane.xlu0 %1000 }
 0x49c   : > { %v1015_v14 = vsub.f32 %v982_v31, %v1001_v6 }
 0x49e   : > { %v1027_v17 = vmul.f32 1.442695, %v1015_v14 }
 0x49f   : > { %v1007_v11 = vpop.xlane.xlu0 %1006 }
 0x4a0   : > { %v1017_v12 = vsub.f32 %v984_v33, %v1007_v11 }
 0x4a2   : > { %v2274_v13 = vpop.eup %1949  ;;  %v1031_v15 = vmul.f32 1.442695, %v1017_v12 }
 0x4a3   : > { %v1044_v16 = vsel %vm986_vm8, %v2274_v13, 0.0  ;;  %v1004_v28 = vpop.xlane.xlu1 %1003 }
 0x4a4   : > { %1951 = vpow2.f32 %v1031_v15  ;;  %1045 = vadd.xlane.f32.xlu1 %v1044_v16  ;;  %v1016_v29 = vsub.f32 %v2258_v43, %v1004_v28 }
 0x4a5   : > { %1953 = vpow2.f32 %v1023_v62 }
 0x4a6   : > { %1955 = vpow2.f32 %v1027_v17  ;;  %v1029_v31 = vmul.f32 1.442695, %v1016_v29 }
 0x4ab   : > { %v1010_v30 = vpop.xlane.xlu1 %1009 }
 0x4ac   : > { %v1018_v32 = vsub.f32 %v985_v54, %v1010_v30 }
 0x4ae   : > { %v2278_v18 = vpop.eup %1951  ;;  %v1033_v33 = vmul.f32 1.442695, %v1018_v32 }
 0x4af   : > { %v1037_v19 = vpop.xlane.xlu0 %1036  ;;  %v1053_v9 = vsel %vm986_vm8, %v2278_v18, 0.0  ;;  %v1954_v20 = vpop.eup %1953 }
 0x4b0   : > { %1054 = vadd.xlane.f32.xlu0 %v1053_v9  ;;  %1957 = vrcp.f32 %v1037_v19  ;;  %v1041_v21 = vsel %vm986_vm8, %v1954_v20, 0.0  ;;  %v2283_v22 = vpop.eup %1955 }
 0x4b1   : > { %v1047_v23 = vsel %vm986_vm8, %v2283_v22, 0.0  ;;  %1959 = vpow2.f32 %v1029_v31 }
 0x4b2   : > { %1961 = vpow2.f32 %v1033_v33 }
 0x4b4   : > { %1042 = vadd.xlane.f32.xlu0 %v1041_v21 }
 0x4b5   : > { %540 = vrot.lane.b32.xlu1 %v2142_v56, %s2002_s29 }
 0x4b8   : > { %1048 = vadd.xlane.f32.xlu0 %v1047_v23 }
 0x4b9   : > { %542 = vrot.lane.b32.xlu1 %v2142_v56, %s2004_s7 }
 0x4ba   : > { %v1958_v24 = vpop.eup %1957 }
 0x4bb   : > { %v1067_v26 = vmul.f32 %v1958_v24, %v1946_v58  ;;  %v2300_v34 = vpop.eup %1959 }
 0x4bc   : > { %v1050_v35 = vsel %vm986_vm8, %v2300_v34, 0.0  ;;  %v2304_v36 = vpop.eup %1961 }
 0x4bd   : > { %545 = vrot.lane.b32.xlu1 %v544_v25, %s2003_s30  ;;  %v1075_v27 = vpack.c.bf16 %v1067_v26, %v1067_v26  ;;  %v1056_v37 = vsel %vm986_vm8, %v2304_v36, 0.0 }
 0x4bf   : > { %1838 = vmatmul.mubr.msk.bf16.vlgmr.msra.gmra.mrb[8].mxu0 %vm986_vm8, %v1075_v27 }
 0x4c0   : > { %1849 = vmatprep.mubr.msk.bf16.mxu0 %vm2001_vm1, %v1998_v2 }
 0x4ce   : > { %538 = vrot.lane.b32.xlu0 %v2142_v56, %s2003_s30  ;;  %s2006_s30 = smov 32  }
 0x4d2   : > { %547 = vrot.lane.b32.xlu0 %v544_v25, %s2002_s29  ;;  %s2005_s29 = smov 16  }
 0x4e1   : > { %1051 = vadd.xlane.f32.xlu1 %v1050_v35 }
 0x4e5   : > { %1057 = vadd.xlane.f32.xlu1 %v1056_v37 }
 0x4f6   : > { %549 = vrot.lane.b32.xlu1 %v544_v25, %s2004_s7  ;;  %s2007_s7 = smov 48  }
 0x521   : > { %v1040_v56 = vpop.xlane.xlu1 %1039 }
 0x522   : > { %1963 = vrcp.f32 %v1040_v56 }
 0x52c   : > { %v1964_v43 = vpop.eup %1963 }
 0x52d   : > { %v1068_v46 = vmul.f32 %v1964_v43, %v2269_v3 }
 0x52f   : > { %v1076_v52 = vpack.c.bf16 %v1068_v46, %v1068_v46 }
 0x531   : > { %v1046_v38 = vpop.xlane.xlu1 %1045 }
 0x535   : > { %v541_v39 = vpop.permute.xlu1 %540 }
 0x536   : > { %v1180_v40 = vsel %vm1086_vm6, %v541_v39, 0 }
 0x537   : > { %1848 = vmatpush3.bf16.msra.mxu0 %v1180_v40 }
 0x538   : > { %1859 = vmatprep.subr.bf16.mxu0 %v1998_v2 }
 0x539   : > { %v543_v49 = vpop.permute.xlu1 %542 }
 0x53a   : > { %v1226_v57 = vsel %vm1086_vm6, %v543_v49, 0 }
 0x53d   : > { %v1055_v41 = vpop.xlane.xlu0 %1054  ;;  %v546_v63 = vpop.permute.xlu1 %545 }
 0x53e   : > { %v1318_v4 = vsel %vm1086_vm6, %v546_v63, 0  ;;  %v1937_v63 = vld [vmem:[%s2398_s3] sm:$0xff]  }
 0x541   : > { %v1043_v42 = vpop.xlane.xlu0 %1042 }
 0x542   : > { %1965 = vrcp.f32 %v1043_v42 }
 0x543   : > { %1967 = vrcp.f32 %v1046_v38 }
 0x545   : > { %v1049_v44 = vpop.xlane.xlu0 %1048 }
 0x546   : > { %1969 = vrcp.f32 %v1049_v44 }
 0x547   : > { %1971 = vrcp.f32 %v1055_v41 }
 0x549   : > { %v539_v47 = vpop.permute.xlu0 %538 }
 0x54a   : > { %v1134_v48 = vsel %vm1086_vm6, %v539_v47, 0 }
 0x54b   : > { %1842 = vmatpush3.bf16.msra.mxu1 %v1134_v48 }
 0x54c   : > { %v1966_v50 = vpop.eup %1965  ;;  %1853 = vmatprep.subr.bf16.mxu1 %v1998_v2 }
 0x54d   : > { %v1968_v53 = vpop.eup %1967  ;;  %v1069_v54 = vmul.f32 %v1966_v50, %v1954_v20  ;;  %v548_v5 = vpop.permute.xlu0 %547 }
 0x54e   : > { %1844 = vmatmul.mubr.msk.bf16.vlgmr.msra.gmra.mrb[28].mxu1 %vm986_vm8, %v1076_v52  ;;  %v1070_v60 = vmul.f32 %v1968_v53, %v2274_v13  ;;  %v1364_v6 = vsel %vm1086_vm6, %v548_v5, 0  ;;  %v1939_v5 = vld [vmem:[%s2398_s3 + $0x10] sm:$0xff]  }
 0x54f   : > { %1854 = vmatpush3.bf16.msra.mxu1 %v1226_v57  ;;  %v1077_v58 = vpack.c.bf16 %v1069_v54, %v1069_v54  ;;  %1855 = vmatprep.mubr.msk.bf16.mxu1 %vm2001_vm1, %v1998_v2 }
 0x550   : > { %v1970_v59 = vpop.eup %1969  ;;  %1865 = vmatprep.subr.bf16.mxu1 %v1998_v2  ;;  %v1078_v3 = vpack.c.bf16 %v1070_v60, %v1070_v60 }
 0x551   : > { %1850 = vmatmul.mubr.msk.bf16.vlgmr.msra.gmra.mrb[12].mxu0 %vm986_vm8, %v1077_v58  ;;  %v1071_v0 = vmul.f32 %v1970_v59, %v2283_v22  ;;  %v1972_v8 = vpop.eup %1971 }
 0x552   : > { %1860 = vmatpush3.bf16.msra.mxu0 %v1272_v61  ;;  %1861 = vmatprep.mubr.msk.bf16.mxu0 %vm2001_vm1, %v1998_v2  ;;  %v1073_v10 = vmul.f32 %v1972_v8, %v2278_v18 }
 0x553   : > { %1871 = vmatprep.subr.bf16.mxu0 %v1998_v2  ;;  %v1079_v45 = vpack.c.bf16 %v1071_v0, %v1071_v0  ;;  %v1938_v0 = vld [vmem:[%s2398_s3 + $0x8] sm:$0xff]  }
 0x554   : > { %v1081_v11 = vpack.c.bf16 %v1073_v10, %v1073_v10  ;;  %v1940_v10 = vld [vmem:[%s2398_s3 + $0x18] sm:$0xff]  }
 0x556   : > { %1856 = vmatmul.mubr.msk.bf16.vlgmr.msra.gmra.mrb[32].mxu1 %vm986_vm8, %v1078_v3 }
 0x557   : > { %1866 = vmatpush3.bf16.msra.mxu1 %v1318_v4  ;;  %1867 = vmatprep.mubr.msk.bf16.mxu1 %vm2001_vm1, %v1998_v2 }
 0x558   : > { %1877 = vmatprep.subr.bf16.mxu1 %v1998_v2 }
 0x559   : > { %1862 = vmatmul.mubr.msk.bf16.vlgmr.msra.gmra.mrb[16].mxu0 %vm986_vm8, %v1079_v45 }
 0x55a   : > { %1872 = vmatpush3.bf16.msra.mxu0 %v1364_v6  ;;  %1873 = vmatprep.mubr.msk.bf16.mxu0 %vm2001_vm1, %v1998_v2 }
 0x55b   : > { %1883 = vmatprep.subr.bf16.mxu0 %v1998_v2 }
 0x561   : > { %1874 = vmatmul.mubr.msk.bf16.vlgmr.msra.gmra.mrb[20].mxu0 %vm986_vm8, %v1081_v11  ;;  %v1739_v11 = vmul.f32 -1.442695, %v2135_v51 }
 0x562   : > { %1891 = vmatprep.mubr.msk.bf16.mxu0 %vm2001_vm1, %v1998_v2  ;;  %1884 = vmatpush3.bf16.msra.mxu0 %v1937_v63 }
 0x563   : > { %1885 = vmatprep.subr.bf16.mxu0 %v1998_v2 }
 0x566   : > { %1886 = vmatpush3.bf16.msra.mxu0 %v1938_v0 }
 0x567   : > { %1887 = vmatprep.subr.bf16.mxu0 %v1998_v2 }
 0x56a   : > { %1888 = vmatpush3.bf16.msra.mxu0 %v1939_v5 }
 0x56b   : > { %1889 = vmatprep.subr.bf16.mxu0 %v1998_v2 }
 0x56e   : > { %v1052_v12 = vpop.xlane.xlu1 %1051  ;;  %1890 = vmatpush3.bf16.msra.mxu0 %v1940_v10 }
 0x56f   : > { %1973 = vrcp.f32 %v1052_v12  ;;  %v1740_v12 = vmul.f32 -1.442695, %v2138_v55 }
 0x572   : > { %v1058_v13 = vpop.xlane.xlu1 %1057 }
 0x573   : > { %1975 = vrcp.f32 %v1058_v13 }
 0x574   : > { %1977 = vpow2.f32 %v1739_v11 }
 0x575   : > { %1979 = vpow2.f32 %v1740_v12 }
 0x576   : > { %v550_v15 = vpop.permute.xlu1 %549 }
 0x577   : > { %v1410_v18 = vsel %vm1086_vm6, %v550_v15, 0 }
 0x579   : > { %v1974_v62 = vpop.eup %1973 }
 0x57a   : > { %v1072_v14 = vmul.f32 %v1974_v62, %v2300_v34 }
 0x57c   : > { %v1080_v16 = vpack.c.bf16 %v1072_v14, %v1072_v14 }
 0x57d   : > { %v1976_v17 = vpop.eup %1975 }
 0x57e   : > { %1868 = vmatmul.mubr.msk.bf16.vlgmr.msra.gmra.mrb[36].mxu1 %vm986_vm8, %v1080_v16  ;;  %v1074_v19 = vmul.f32 %v1976_v17, %v2304_v36  ;;  %v1978_v13 = vpop.eup %1977 }
 0x57f   : > { %1878 = vmatpush3.bf16.msra.mxu1 %v1410_v18  ;;  %1879 = vmatprep.mubr.msk.bf16.mxu1 %vm2001_vm1, %v1998_v2  ;;  %v1980_v62 = vpop.eup %1979  ;;  %v1490_v14 = vadd.f32 1.0, %v1978_v13 }
 0x580   : > { %v1082_v9 = vpack.c.bf16 %v1074_v19, %v1074_v19  ;;  %v1491_v15 = vadd.f32 1.0, %v1980_v62 }
 0x581   : > { %1981 = vrcp.f32 %v1490_v14 }
 0x582   : > { %1983 = vrcp.f32 %v1491_v15 }
 0x586   : > { %1880 = vmatmul.mubr.msk.bf16.vlgmr.msra.gmra.mrb[40].mxu1 %vm986_vm8, %v1082_v9 }
 0x58b   : > { %v1982_v16 = vpop.eup %1981 }
 0x58c   : > { %v1984_v17 = vpop.eup %1983  ;;  %v1496_v19 = vmul.f32 %v1982_v16, %v2135_v51 }
 0x58d   : > { %v1497_v2 = vmul.f32 %v1984_v17, %v2138_v55 }
 0x592   : > { %v1124_v20 = vpop.f32.mrb[8].mxu0 }
 0x593   : > { %v1839_v21 = vpop.f32.mrb[9].mxu0 }
 0x594   : > { %v1127_v22 = vpop.f32.mrb[10].mxu0 }
 0x595   : > { %v1840_v23 = vpop.f32.mrb[11].mxu0 }
 0x621   : > { %v1170_v24 = vpop.f32.mrb[28].mxu1 }
 0x622   : > { %v1845_v25 = vpop.f32.mrb[29].mxu1  ;;  %1453 = vrot.lane.b32.xlu0 %v1170_v24, %s2005_s29 }
 0x623   : > { %v1173_v26 = vpop.f32.mrb[30].mxu1 }
 0x624   : > { %v1846_v27 = vpop.f32.mrb[31].mxu1  ;;  %v1216_v28 = vpop.f32.mrb[12].mxu0 }
 0x625   : > { %v1851_v29 = vpop.f32.mrb[13].mxu0 }
 0x626   : > { %v1219_v30 = vpop.f32.mrb[14].mxu0  ;;  %1457 = vrot.lane.b32.xlu0 %v1216_v28, %s2006_s30 }
 0x627   : > { %v1852_v31 = vpop.f32.mrb[15].mxu0 }
 0x629   : > { %v1262_v32 = vpop.f32.mrb[32].mxu1 }
 0x62a   : > { %v1857_v33 = vpop.f32.mrb[33].mxu1  ;;  %1461 = vrot.lane.b32.xlu0 %v1262_v32, %s2007_s7 }
 0x62b   : > { %v1265_v34 = vpop.f32.mrb[34].mxu1 }
 0x62c   : > { %v1858_v35 = vpop.f32.mrb[35].mxu1  ;;  %v1308_v36 = vpop.f32.mrb[16].mxu0 }
 0x62d   : > { %v1863_v37 = vpop.f32.mrb[17].mxu0 }
 0x62e   : > { %v1311_v56 = vpop.f32.mrb[18].mxu0 }
 0x62f   : > { %v1864_v38 = vpop.f32.mrb[19].mxu0 }
 0x634   : > { %v1400_v39 = vpop.f32.mrb[20].mxu0 }
 0x635   : > { %v1875_v40 = vpop.f32.mrb[21].mxu0 }
 0x636   : > { %v1403_v41 = vpop.f32.mrb[22].mxu0 }
 0x637   : > { %v1876_v42 = vpop.f32.mrb[23].mxu0 }
 0x638   : > { %v1746_v42 = vld [vmem:[%s2396_s1 + $0x2] ss:$0 sm:$0xff] }
 0x651   : > { %v1354_v43 = vpop.f32.mrb[36].mxu1 }
 0x652   : > { %1470 = vrot.lane.b32.xlu1 %v1354_v43, %s2005_s29  ;;  %v1869_v44 = vpop.f32.mrb[37].mxu1  ;;  %v1747_v43 = vld [vmem:[%s2396_s1 + $0x3] ss:$0 sm:$0xff] }
 0x653   : > { %v1357_v46 = vpop.f32.mrb[38].mxu1 }
 0x654   : > { %v1870_v47 = vpop.f32.mrb[39].mxu1 }
 0x656   : > { %1474 = vrot.lane.b32.xlu1 %v1400_v39, %s2006_s30 }
 0x659   : > { %v1446_v48 = vpop.f32.mrb[40].mxu1 }
 0x65a   : > { %v1881_v49 = vpop.f32.mrb[41].mxu1  ;;  %1478 = vrot.lane.b32.xlu1 %v1446_v48, %s2007_s7 }
 0x65b   : > { %v1449_v50 = vpop.f32.mrb[42].mxu1  ;;  %v1989_v49 = vld [vmem:[%s2059_s27] sm:$0xff] }
 0x65c   : > { %v1882_v52 = vpop.f32.mrb[43].mxu1 }
 0x694   : > { %v1454_v53 = vpop.permute.xlu0 %1453 }
 0x695   : > { %v1464_v57 = vsel %vm609_vm5, %v1124_v20, %v1454_v53 }
 0x698   : > { %v1458_v54 = vpop.permute.xlu0 %1457 }
 0x699   : > { %v1466_v58 = vsel %vm1465_vm9, %v1464_v57, %v1458_v54 }
 0x69c   : > { %v1462_v59 = vpop.permute.xlu0 %1461 }
 0x69d   : > { %v1468_v60 = vsel %vm1467_vm10, %v1466_v58, %v1462_v59 }
 0x69e   : > { %1500 = vrot.lane.b32.xlu0 %v1468_v60, %s2000_s25 }
 0x6c4   : > { %v1471_v61 = vpop.permute.xlu1 %1470 }
 0x6c5   : > { %v1481_v4 = vsel %vm609_vm5, %v1308_v36, %v1471_v61 }
 0x6c8   : > { %v1475_v3 = vpop.permute.xlu1 %1474 }
 0x6c9   : > { %v1482_v45 = vsel %vm1465_vm9, %v1481_v4, %v1475_v3 }
 0x6cc   : > { %v1479_v8 = vpop.permute.xlu1 %1478 }
 0x6cd   : > { %v1483_v6 = vsel %vm1467_vm10, %v1482_v45, %v1479_v8 }
 0x6ce   : > { %1502 = vrot.lane.b32.xlu1 %v1483_v6, %s2000_s25 }
 0x710   : > { %v1501_v18 = vpop.permute.xlu0 %1500 }
 0x711   : > { %v1506_v20 = vmul.f32 %v1501_v18, %v1496_v19 }
 0x740   : > { %v1503_v9 = vpop.permute.xlu1 %1502 }
 0x741   : > { %v1507_v21 = vmul.f32 %v1503_v9, %v1497_v2 }
 0x743   : > { %v1508_v22 = vpack.c.bf16 %v1507_v21, %v1506_v20 }
 0x745   : > { %1518 = vrot.lane.b32.xlu0 %v1508_v22, %s2000_s25 }
 0x7b7   : > { %v1519_v23 = vpop.permute.xlu0 %1518 }
 0x7b8   : > { %1892 = vmatmul.mubr.msk.bf16.vlgmr.msra.gmra.mrb[24].mxu0 %vm1544_vm11, %v1519_v23 }
 0x88b   : > { %v1582_v24 = vpop.f32.mrb[24].mxu0 }
 0x88c   : > { %1591 = vadd.xlane.f32.xlu1 %v1582_v24  ;;  %v1893_v25 = vpop.f32.mrb[25].mxu0 }
 0x88d   : > { %v1585_v26 = vpop.f32.mrb[26].mxu0 }
 0x88e   : > { %1593 = vadd.xlane.f32.xlu0 %v1585_v26  ;;  %v1894_v27 = vpop.f32.mrb[27].mxu0 }
 0x919   : > { %v1592_v28 = vpop.xlane.xlu1 %1591 }
 0x91a   : > { %v1595_v29 = vmul.f32 0.03125, %v1592_v28 }
 0x91b   : > { %v1594_v51 = vpop.xlane.xlu0 %1593 }
 0x91c   : > { %v1597_v30 = vsub.f32 %v1582_v24, %v1595_v29  ;;  %v1596_v55 = vmul.f32 0.03125, %v1594_v51 }
 0x91e   : > { %v1598_v31 = vsub.f32 %v1585_v26, %v1596_v55  ;;  %v1599_v32 = vsel %vm270_vm0, %v1597_v30, 0.0 }
 0x91f   : > { %v1601_v33 = vmul.f32 %v1599_v32, %v1599_v32 }
 0x920   : > { %v1600_v34 = vsel %vm270_vm0, %v1598_v31, 0.0 }
 0x921   : > { %1603 = vadd.xlane.f32.xlu0 %v1601_v33  ;;  %v1602_v35 = vmul.f32 %v1600_v34, %v1600_v34 }
 0x925   : > { %1605 = vadd.xlane.f32.xlu0 %v1602_v35 }
 0x9ae   : > { %v1604_v36 = vpop.xlane.xlu0 %1603 }
 0x9af   : > { %v1607_v37 = vmul.f32 0.03125, %v1604_v36 }
 0x9b1   : > { %v1609_v56 = vadd.f32 1e-05, %v1607_v37 }
 0x9b2   : > { %v1606_v38 = vpop.xlane.xlu0 %1605 }
 0x9b3   : > { %1985 = vrsqrt.f32 %v1609_v56  ;;  %v1608_v39 = vmul.f32 0.03125, %v1606_v38 }
 0x9b5   : > { %v1610_v40 = vadd.f32 1e-05, %v1608_v39 }
 0x9b7   : > { %1987 = vrsqrt.f32 %v1610_v40 }
 0x9bd   : > { %v1986_v41 = vpop.eup %1985 }
 0x9be   : > { %v1613_v7 = vmul.f32 %v1986_v41, %v1599_v32 }
 0x9c0   : > { %v1619_v44 = vmul.f32 %v1746_v42, %v1613_v7 }
 0x9c1   : > { %v1988_v46 = vpop.eup %1987 }
 0x9c2   : > { %v1625_v47 = vadd.f32 %v1747_v43, %v1619_v44  ;;  %v1614_v48 = vmul.f32 %v1988_v46, %v1600_v34 }
 0x9c4   : > { %v1627_v50 = vadd.f32 %v1989_v49, %v1625_v47  ;;  %v1620_v52 = vmul.f32 %v1746_v42, %v1614_v48 }
 0x9c6   : > { %1629 = vst [vmem:[%s253_s22] sm:$0xff] %v1627_v50  ;;  %v1626_v53 = vadd.f32 %v1747_v43, %v1620_v52 }
 0x9c8   : > { %v1628_v54 = vadd.f32 %v1626_v53, %v2063_v1 }
 0x9ca   : > { %1630 = vst [vmem:[%s253_s22 + $0x8] sm:$0xff] %v1628_v54 }
 0x9cb PF: > { %s16_s21 = sadd.s32 1, %s1996_s21  }
 0x9cc   : > { %p13_p4 = scmp.ge.s32.totalorder %s16_s21, 4  }
 0x9ce   :  { %15 = sbr.rel (!%p13_p4) target bundleno = 1 (0x1), region = 74 }

</bundles_post_ra>
